<compile_context>
chip_gen: v6e
topology: v6e:2x2x1
jax: 0.10.0
libtpu: 0.0.40
codegen_flags: <defaults>
</compile_context>

<pallas_src>
import functools

import jax
import jax.numpy as jnp
from jax.experimental import pallas as pl
from jax.experimental.pallas import tpu as pltpu


def _round_up(x, m):
    return (x + m - 1) // m * m


def mlp_kernel(x_ref,
               w1, b1, w2, b2, w3, b3, w5, b5, w6, b6, w4, b4,
               o_ref):
    """Full MLP forward for one batch tile, entirely in VMEM."""

    def layer(h, w_ref, b_ref):
        # MXU matmul in the weight dtype (bf16), f32 accumulation; bias add and
        # ReLU stay on the f32 accumulator, then cast back for the next pass.
        acc = jnp.dot(h, w_ref[...], preferred_element_type=jnp.float32)
        acc = jnp.maximum(acc + b_ref[...], 0.0)
        return acc.astype(w_ref.dtype)

    h = x_ref[...]
    h = layer(h, w1, b1)
    h = layer(h, w2, b2)
    h = layer(h, w3, b3)
    h = layer(h, w5, b5)
    h = layer(h, w6, b6)
    out = jnp.dot(h, w4[...], preferred_element_type=jnp.float32) + b4[...]
    o_ref[...] = out.astype(o_ref.dtype)


_ORDER = ["w1", "b1", "w2", "b2", "w3", "b3", "w5", "b5", "w6", "b6", "w4", "b4"]


@functools.partial(jax.jit, static_argnames=("tile_b",))
def mlp_forward(x, params, *, tile_b=256):
    """x: [B, input_dim] float32. params: dict of (in,out) weights + (1,out) biases."""
    B, D = x.shape
    emb = params["w4"].shape[1]
    emb_pad = _round_up(emb, 128)          # lane-dense output (unmasked vst)
    d_pad = _round_up(D, 128)              # lane-dense input loads

    # Pick an effective batch tile and pad the batch to a multiple of it.
    tile_b = min(tile_b, _round_up(B, 8))
    b_pad = _round_up(B, tile_b)

    # bf16 activations for the MXU; zero-pad batch rows and feature lanes
    # (padded lanes multiply zero weight rows, so the result is unchanged).
    x = x.astype(jnp.bfloat16)
    if (b_pad, d_pad) != (B, D):
        x = jnp.pad(x, ((0, b_pad - B), (0, d_pad - D)))

    # Prepare parameters: bf16 weights for the MXU, f32 biases; pad fc1's input
    # rows to d_pad and the final layer's columns to 128 lanes with zeros.
    prep = {}
    for name in _ORDER:
        p = params[name]
        if name == "w1":
            p = jnp.pad(p, ((0, d_pad - D), (0, 0)))
        if name in ("w4", "b4"):
            p = jnp.pad(p, ((0, 0), (0, emb_pad - emb)))
        if name.startswith("w"):
            p = p.astype(jnp.bfloat16)
        prep[name] = p

    def full_spec(shape):
        # Whole parameter resident in VMEM; index_map is grid-invariant so the
        # same tile is reused every step (weights total ~0.5 MiB in bf16).
        return pl.BlockSpec(shape, lambda i: (0, 0))

    param_specs = [full_spec(prep[name].shape) for name in _ORDER]
    param_args = [prep[name] for name in _ORDER]

    flops = 2 * b_pad * (d_pad * 256 + 256 * 128 + 128 * 256
                         + 256 * 256 + 256 * 256 + 256 * emb_pad)
    bytes_accessed = (b_pad * d_pad * 2                   # bf16 input
                      + b_pad * emb_pad * 4               # f32 output
                      + sum(int(p.size) * p.dtype.itemsize for p in param_args))

    out = pl.pallas_call(
        mlp_kernel,
        out_shape=jax.ShapeDtypeStruct((b_pad, emb_pad), jnp.float32),
        grid_spec=pltpu.PrefetchScalarGridSpec(
            num_scalar_prefetch=0,
            grid=(b_pad // tile_b,),
            in_specs=[pl.BlockSpec((tile_b, d_pad), lambda i: (i, 0))] + param_specs,
            out_specs=pl.BlockSpec((tile_b, emb_pad), lambda i: (i, 0)),
        ),
        compiler_params=pltpu.CompilerParams(
            dimension_semantics=("parallel",)),
        cost_estimate=pl.CostEstimate(
            flops=int(flops), transcendentals=0,
            bytes_accessed=int(bytes_accessed)),
    )(x, *param_args)

    return out[:B, :emb]


def init_params(key, input_dim, embedding_dim):
    dims = {
        "1": (input_dim, 256),
        "2": (256, 128),
        "3": (128, 256),
        "5": (256, 256),
        "6": (256, 256),
        "4": (256, embedding_dim),
    }
    params = {}
    for name, (din, dout) in dims.items():
        key, kw, kb = jax.random.split(key, 3)
        params[f"w{name}"] = jax.random.normal(kw, (din, dout), jnp.float32) * 0.02
        params[f"b{name}"] = jax.random.normal(kb, (1, dout), jnp.float32) * 0.02
    return params


def mlp_reference(x, params, compute_dtype=jnp.float32):
    """Pure-JAX reference (dropout = identity in eval).

    compute_dtype=bfloat16 mirrors the kernel's MXU precision path
    (bf16 operands, f32 accumulation, f32 bias/ReLU).
    """
    def lin(h, w, b):
        return jnp.dot(h.astype(compute_dtype), w.astype(compute_dtype),
                       preferred_element_type=jnp.float32) + b
    h = jnp.maximum(lin(x, params["w1"], params["b1"]), 0.0)
    h = jnp.maximum(lin(h, params["w2"], params["b2"]), 0.0)
    h = jnp.maximum(lin(h, params["w3"], params["b3"]), 0.0)
    h = jnp.maximum(lin(h, params["w5"], params["b5"]), 0.0)
    h = jnp.maximum(lin(h, params["w6"], params["b6"]), 0.0)
    return lin(h, params["w4"], params["b4"])


if __name__ == "__main__":
    key = jax.random.PRNGKey(0)
    k_param, k_x = jax.random.split(key)

    batch = 512          # grid of 2 tiles at tile_b=256 (keeps both v7x TCs busy)
    input_dim = 64
    embedding_dim = 32

    params = init_params(k_param, input_dim, embedding_dim)
    x = jax.random.normal(k_x, (batch, input_dim), jnp.float32)

    out = jax.block_until_ready(mlp_forward(x, params, tile_b=256))
    assert out.shape == (batch, embedding_dim)

    # Tight check against a reference using the same bf16-operand precision path.
    ref_bf16 = mlp_reference(x, params, compute_dtype=jnp.bfloat16)
    assert jnp.allclose(out, ref_bf16, atol=1e-3, rtol=1e-3), \
        float(jnp.max(jnp.abs(out - ref_bf16)))

    # Loose check against the full-f32 reference (bf16 rounding tolerance).
    ref_f32 = mlp_reference(x, params, compute_dtype=jnp.float32)
    assert jnp.allclose(out, ref_f32, atol=2e-2, rtol=2e-2), \
        float(jnp.max(jnp.abs(out - ref_f32)))

    print("KERNEL_OK")
</pallas_src>

<mosaic_0001>
module attributes {stable_mosaic.version = 11 : i64} {
  func.func @mlp_kernel(%arg0: i32, %arg1: memref<256x128xbf16, #tpu.memory_space<vmem>>, %arg2: memref<128x256xbf16, #tpu.memory_space<vmem>>, %arg3: memref<1x256xf32, #tpu.memory_space<vmem>>, %arg4: memref<256x128xbf16, #tpu.memory_space<vmem>>, %arg5: memref<1x128xf32, #tpu.memory_space<vmem>>, %arg6: memref<128x256xbf16, #tpu.memory_space<vmem>>, %arg7: memref<1x256xf32, #tpu.memory_space<vmem>>, %arg8: memref<256x256xbf16, #tpu.memory_space<vmem>>, %arg9: memref<1x256xf32, #tpu.memory_space<vmem>>, %arg10: memref<256x256xbf16, #tpu.memory_space<vmem>>, %arg11: memref<1x256xf32, #tpu.memory_space<vmem>>, %arg12: memref<256x128xbf16, #tpu.memory_space<vmem>>, %arg13: memref<1x128xf32, #tpu.memory_space<vmem>>, %arg14: memref<256x128xf32, #tpu.memory_space<vmem>>) attributes {dimension_semantics = [#tpu.dimension_semantics<parallel>], iteration_bounds = array<i64: 2>, scalar_prefetch = 0 : i64, scratch_operands = 0 : i64, tpu.core_type = #tpu.core_type<tc>, window_params = [{transform_indices = @transform_0, window_bounds = array<i64: 256, 128>}, {pipeline_mode = #tpu.pipeline_mode<synchronous>, transform_indices = @transform_1, window_bounds = array<i64: 128, 256>}, {pipeline_mode = #tpu.pipeline_mode<synchronous>, transform_indices = @transform_2, window_bounds = array<i64: 1, 256>}, {pipeline_mode = #tpu.pipeline_mode<synchronous>, transform_indices = @transform_3, window_bounds = array<i64: 256, 128>}, {pipeline_mode = #tpu.pipeline_mode<synchronous>, transform_indices = @transform_4, window_bounds = array<i64: 1, 128>}, {pipeline_mode = #tpu.pipeline_mode<synchronous>, transform_indices = @transform_5, window_bounds = array<i64: 128, 256>}, {pipeline_mode = #tpu.pipeline_mode<synchronous>, transform_indices = @transform_6, window_bounds = array<i64: 1, 256>}, {pipeline_mode = #tpu.pipeline_mode<synchronous>, transform_indices = @transform_7, window_bounds = array<i64: 256, 256>}, {pipeline_mode = #tpu.pipeline_mode<synchronous>, transform_indices = @transform_8, window_bounds = array<i64: 1, 256>}, {pipeline_mode = #tpu.pipeline_mode<synchronous>, transform_indices = @transform_9, window_bounds = array<i64: 256, 256>}, {pipeline_mode = #tpu.pipeline_mode<synchronous>, transform_indices = @transform_10, window_bounds = array<i64: 1, 256>}, {pipeline_mode = #tpu.pipeline_mode<synchronous>, transform_indices = @transform_11, window_bounds = array<i64: 256, 128>}, {pipeline_mode = #tpu.pipeline_mode<synchronous>, transform_indices = @transform_12, window_bounds = array<i64: 1, 128>}, {transform_indices = @transform_13, window_bounds = array<i64: 256, 128>}]} {
    %c0 = arith.constant 0 : index
    %c0_0 = arith.constant 0 : index
    %0 = vector.load %arg1[%c0, %c0_0] : memref<256x128xbf16, #tpu.memory_space<vmem>>, vector<256x128xbf16>
    %c0_1 = arith.constant 0 : index
    %c0_2 = arith.constant 0 : index
    %1 = vector.load %arg2[%c0_1, %c0_2] : memref<128x256xbf16, #tpu.memory_space<vmem>>, vector<128x256xbf16>
    %cst = arith.constant dense<0.000000e+00> : vector<256x256xf32>
    %2 = tpu.matmul %0, %1, %cst {dimension_numbers = #tpu.dot_dimension_numbers<[1], [0], [0], [1], [0, 0, 1, 1], [], []>} : vector<256x128xbf16>, vector<128x256xbf16>, vector<256x256xf32> -> vector<256x256xf32>
    %c0_3 = arith.constant 0 : index
    %c0_4 = arith.constant 0 : index
    %3 = vector.load %arg3[%c0_3, %c0_4] : memref<1x256xf32, #tpu.memory_space<vmem>>, vector<1x256xf32>
    %4 = vector.broadcast %3 : vector<1x256xf32> to vector<256x256xf32>
    %5 = arith.addf %2, %4 : vector<256x256xf32>
    %cst_5 = arith.constant 0.000000e+00 : f32
    %6 = vector.broadcast %cst_5 : f32 to vector<256x256xf32>
    %7 = arith.maximumf %5, %6 : vector<256x256xf32>
    %8 = arith.truncf %7 : vector<256x256xf32> to vector<256x256xbf16>
    %c0_6 = arith.constant 0 : index
    %c0_7 = arith.constant 0 : index
    %9 = vector.load %arg4[%c0_6, %c0_7] : memref<256x128xbf16, #tpu.memory_space<vmem>>, vector<256x128xbf16>
    %cst_8 = arith.constant dense<0.000000e+00> : vector<256x128xf32>
    %10 = tpu.matmul %8, %9, %cst_8 {dimension_numbers = #tpu.dot_dimension_numbers<[1], [0], [0], [1], [0, 0, 1, 1], [], []>} : vector<256x256xbf16>, vector<256x128xbf16>, vector<256x128xf32> -> vector<256x128xf32>
    %c0_9 = arith.constant 0 : index
    %c0_10 = arith.constant 0 : index
    %11 = vector.load %arg5[%c0_9, %c0_10] : memref<1x128xf32, #tpu.memory_space<vmem>>, vector<1x128xf32>
    %12 = vector.broadcast %11 : vector<1x128xf32> to vector<256x128xf32>
    %13 = arith.addf %10, %12 : vector<256x128xf32>
    %cst_11 = arith.constant 0.000000e+00 : f32
    %14 = vector.broadcast %cst_11 : f32 to vector<256x128xf32>
    %15 = arith.maximumf %13, %14 : vector<256x128xf32>
    %16 = arith.truncf %15 : vector<256x128xf32> to vector<256x128xbf16>
    %c0_12 = arith.constant 0 : index
    %c0_13 = arith.constant 0 : index
    %17 = vector.load %arg6[%c0_12, %c0_13] : memref<128x256xbf16, #tpu.memory_space<vmem>>, vector<128x256xbf16>
    %cst_14 = arith.constant dense<0.000000e+00> : vector<256x256xf32>
    %18 = tpu.matmul %16, %17, %cst_14 {dimension_numbers = #tpu.dot_dimension_numbers<[1], [0], [0], [1], [0, 0, 1, 1], [], []>} : vector<256x128xbf16>, vector<128x256xbf16>, vector<256x256xf32> -> vector<256x256xf32>
    %c0_15 = arith.constant 0 : index
    %c0_16 = arith.constant 0 : index
    %19 = vector.load %arg7[%c0_15, %c0_16] : memref<1x256xf32, #tpu.memory_space<vmem>>, vector<1x256xf32>
    %20 = vector.broadcast %19 : vector<1x256xf32> to vector<256x256xf32>
    %21 = arith.addf %18, %20 : vector<256x256xf32>
    %cst_17 = arith.constant 0.000000e+00 : f32
    %22 = vector.broadcast %cst_17 : f32 to vector<256x256xf32>
    %23 = arith.maximumf %21, %22 : vector<256x256xf32>
    %24 = arith.truncf %23 : vector<256x256xf32> to vector<256x256xbf16>
    %c0_18 = arith.constant 0 : index
    %c0_19 = arith.constant 0 : index
    %25 = vector.load %arg8[%c0_18, %c0_19] : memref<256x256xbf16, #tpu.memory_space<vmem>>, vector<256x256xbf16>
    %cst_20 = arith.constant dense<0.000000e+00> : vector<256x256xf32>
    %26 = tpu.matmul %24, %25, %cst_20 {dimension_numbers = #tpu.dot_dimension_numbers<[1], [0], [0], [1], [0, 0, 1, 1], [], []>} : vector<256x256xbf16>, vector<256x256xbf16>, vector<256x256xf32> -> vector<256x256xf32>
    %c0_21 = arith.constant 0 : index
    %c0_22 = arith.constant 0 : index
    %27 = vector.load %arg9[%c0_21, %c0_22] : memref<1x256xf32, #tpu.memory_space<vmem>>, vector<1x256xf32>
    %28 = vector.broadcast %27 : vector<1x256xf32> to vector<256x256xf32>
    %29 = arith.addf %26, %28 : vector<256x256xf32>
    %cst_23 = arith.constant 0.000000e+00 : f32
    %30 = vector.broadcast %cst_23 : f32 to vector<256x256xf32>
    %31 = arith.maximumf %29, %30 : vector<256x256xf32>
    %32 = arith.truncf %31 : vector<256x256xf32> to vector<256x256xbf16>
    %c0_24 = arith.constant 0 : index
    %c0_25 = arith.constant 0 : index
    %33 = vector.load %arg10[%c0_24, %c0_25] : memref<256x256xbf16, #tpu.memory_space<vmem>>, vector<256x256xbf16>
    %cst_26 = arith.constant dense<0.000000e+00> : vector<256x256xf32>
    %34 = tpu.matmul %32, %33, %cst_26 {dimension_numbers = #tpu.dot_dimension_numbers<[1], [0], [0], [1], [0, 0, 1, 1], [], []>} : vector<256x256xbf16>, vector<256x256xbf16>, vector<256x256xf32> -> vector<256x256xf32>
    %c0_27 = arith.constant 0 : index
    %c0_28 = arith.constant 0 : index
    %35 = vector.load %arg11[%c0_27, %c0_28] : memref<1x256xf32, #tpu.memory_space<vmem>>, vector<1x256xf32>
    %36 = vector.broadcast %35 : vector<1x256xf32> to vector<256x256xf32>
    %37 = arith.addf %34, %36 : vector<256x256xf32>
    %cst_29 = arith.constant 0.000000e+00 : f32
    %38 = vector.broadcast %cst_29 : f32 to vector<256x256xf32>
    %39 = arith.maximumf %37, %38 : vector<256x256xf32>
    %40 = arith.truncf %39 : vector<256x256xf32> to vector<256x256xbf16>
    %c0_30 = arith.constant 0 : index
    %c0_31 = arith.constant 0 : index
    %41 = vector.load %arg12[%c0_30, %c0_31] : memref<256x128xbf16, #tpu.memory_space<vmem>>, vector<256x128xbf16>
    %cst_32 = arith.constant dense<0.000000e+00> : vector<256x128xf32>
    %42 = tpu.matmul %40, %41, %cst_32 {dimension_numbers = #tpu.dot_dimension_numbers<[1], [0], [0], [1], [0, 0, 1, 1], [], []>} : vector<256x256xbf16>, vector<256x128xbf16>, vector<256x128xf32> -> vector<256x128xf32>
    %c0_33 = arith.constant 0 : index
    %c0_34 = arith.constant 0 : index
    %43 = vector.load %arg13[%c0_33, %c0_34] : memref<1x128xf32, #tpu.memory_space<vmem>>, vector<1x128xf32>
    %44 = vector.broadcast %43 : vector<1x128xf32> to vector<256x128xf32>
    %45 = arith.addf %42, %44 : vector<256x128xf32>
    %c0_35 = arith.constant 0 : index
    %c0_36 = arith.constant 0 : index
    %46 = vector.load %arg14[%c0_35, %c0_36] : memref<256x128xf32, #tpu.memory_space<vmem>>, vector<256x128xf32>
    tpu.vector_store %arg14[%c0_35, %c0_36], %45 {strides = array<i32>} : memref<256x128xf32, #tpu.memory_space<vmem>>, vector<256x128xf32>,
    return
  }
  func.func @transform_0(%arg0: i32) -> (i32, i32) {
    %c0_i32 = arith.constant 0 : i32
    %c0_i32_0 = arith.constant 0 : i32
    return %arg0, %c0_i32 : i32, i32
  }
  func.func @transform_1(%arg0: i32) -> (i32, i32) {
    %c0_i32 = arith.constant 0 : i32
    %c0_i32_0 = arith.constant 0 : i32
    %c0_i32_1 = arith.constant 0 : i32
    return %c0_i32, %c0_i32_0 : i32, i32
  }
  func.func @transform_2(%arg0: i32) -> (i32, i32) {
    %c0_i32 = arith.constant 0 : i32
    %c0_i32_0 = arith.constant 0 : i32
    %c0_i32_1 = arith.constant 0 : i32
    return %c0_i32, %c0_i32_0 : i32, i32
  }
  func.func @transform_3(%arg0: i32) -> (i32, i32) {
    %c0_i32 = arith.constant 0 : i32
    %c0_i32_0 = arith.constant 0 : i32
    %c0_i32_1 = arith.constant 0 : i32
    return %c0_i32, %c0_i32_0 : i32, i32
  }
  func.func @transform_4(%arg0: i32) -> (i32, i32) {
    %c0_i32 = arith.constant 0 : i32
    %c0_i32_0 = arith.constant 0 : i32
    %c0_i32_1 = arith.constant 0 : i32
    return %c0_i32, %c0_i32_0 : i32, i32
  }
  func.func @transform_5(%arg0: i32) -> (i32, i32) {
    %c0_i32 = arith.constant 0 : i32
    %c0_i32_0 = arith.constant 0 : i32
    %c0_i32_1 = arith.constant 0 : i32
    return %c0_i32, %c0_i32_0 : i32, i32
  }
  func.func @transform_6(%arg0: i32) -> (i32, i32) {
    %c0_i32 = arith.constant 0 : i32
    %c0_i32_0 = arith.constant 0 : i32
    %c0_i32_1 = arith.constant 0 : i32
    return %c0_i32, %c0_i32_0 : i32, i32
  }
  func.func @transform_7(%arg0: i32) -> (i32, i32) {
    %c0_i32 = arith.constant 0 : i32
    %c0_i32_0 = arith.constant 0 : i32
    %c0_i32_1 = arith.constant 0 : i32
    return %c0_i32, %c0_i32_0 : i32, i32
  }
  func.func @transform_8(%arg0: i32) -> (i32, i32) {
    %c0_i32 = arith.constant 0 : i32
    %c0_i32_0 = arith.constant 0 : i32
    %c0_i32_1 = arith.constant 0 : i32
    return %c0_i32, %c0_i32_0 : i32, i32
  }
  func.func @transform_9(%arg0: i32) -> (i32, i32) {
    %c0_i32 = arith.constant 0 : i32
    %c0_i32_0 = arith.constant 0 : i32
    %c0_i32_1 = arith.constant 0 : i32
    return %c0_i32, %c0_i32_0 : i32, i32
  }
  func.func @transform_10(%arg0: i32) -> (i32, i32) {
    %c0_i32 = arith.constant 0 : i32
    %c0_i32_0 = arith.constant 0 : i32
    %c0_i32_1 = arith.constant 0 : i32
    return %c0_i32, %c0_i32_0 : i32, i32
  }
  func.func @transform_11(%arg0: i32) -> (i32, i32) {
    %c0_i32 = arith.constant 0 : i32
    %c0_i32_0 = arith.constant 0 : i32
    %c0_i32_1 = arith.constant 0 : i32
    return %c0_i32, %c0_i32_0 : i32, i32
  }
  func.func @transform_12(%arg0: i32) -> (i32, i32) {
    %c0_i32 = arith.constant 0 : i32
    %c0_i32_0 = arith.constant 0 : i32
    %c0_i32_1 = arith.constant 0 : i32
    return %c0_i32, %c0_i32_0 : i32, i32
  }
  func.func @transform_13(%arg0: i32) -> (i32, i32) {
    %c0_i32 = arith.constant 0 : i32
    %c0_i32_0 = arith.constant 0 : i32
    return %arg0, %c0_i32 : i32, i32
  }
}

</mosaic_0001>

<bundles_post_ra>
// kernel: mlp_forward.1
= control target key start
LH: loop header
LB: loop body
LE: loop exit
PB: predicated region body
PF: predicated region fallthrough
CT: control target
= control target key end

     0   :  { %s3742_s25 = smov 0   ;;  %s4601_s0 = inlined_call_operand.vmem [shape: bf16[512,128], index: 0, kind: input, shape index: {}]   ;;  %s4602_s1 = inlined_call_operand.vmem [shape: bf16[128,256], index: 1, kind: input, shape index: {}]   ;;  %s4603_s2 = inlined_call_operand.vmem [shape: f32[1,256], index: 2, kind: input, shape index: {}]   ;;  %s4604_s3 = inlined_call_operand.vmem [shape: bf16[256,128], index: 3, kind: input, shape index: {}]   ;;  %s4605_s4 = inlined_call_operand.vmem [shape: f32[1,128], index: 4, kind: input, shape index: {}]   ;;  %s4606_s5 = inlined_call_operand.vmem [shape: bf16[128,256], index: 5, kind: input, shape index: {}]   ;;  %s4607_s6 = inlined_call_operand.vmem [shape: f32[1,256], index: 6, kind: input, shape index: {}]   ;;  %s4608_s7 = inlined_call_operand.vmem [shape: bf16[256,256], index: 7, kind: input, shape index: {}]   ;;  %s4609_s8 = inlined_call_operand.vmem [shape: f32[1,256], index: 8, kind: input, shape index: {}]   ;;  %s4610_s9 = inlined_call_operand.vmem [shape: bf16[256,256], index: 9, kind: input, shape index: {}]   ;;  %s4611_s10 = inlined_call_operand.vmem [shape: f32[1,256], index: 10, kind: input, shape index: {}]   ;;  %s4612_s11 = inlined_call_operand.vmem [shape: bf16[256,128], index: 11, kind: input, shape index: {}]   ;;  %s4613_s12 = inlined_call_operand.vmem [shape: f32[1,128], index: 12, kind: input, shape index: {}]   ;;  %s4614_s13 = inlined_call_operand.vmem [shape: f32[512,128], index: 13, kind: output, shape index: {}]  }
   0x1 LB: > { %s3081_s26 = sadd.s32 4294967295, %s3669_s25   ;;  %p3085_p0 = scmp.ge.s32.totalorder %s3669_s25, 1  ;;  %s3669_s25 = sphi %s3742_s25, %s23_s25  }
   0x2   : > { %p388_p1 = scmp.lt.s32.totalorder %s3669_s25, 3 }
   0x4   : > { %p389_p2 = pnand %p3085_p0, %p388_p1 }
   0x5   : > { %s3086_s29 = sshll.u32 (!%p389_p2), %s3081_s26, 5 }
   0x6   : > { %392 = sbr.rel (%p389_p2) target bundleno = 1399 (0x577), region = 72  ;;  %p433_p3 = scmp.lt.s32.totalorder (!%p389_p2), %s3086_s29, 63 }
   0xb   : > { %v3471_v0 = vld [vmem:[%s4602_s1 + $0x74] ss:$8 sps:$4 sm:$0xff]   ;;  %v3473_v1 = vld [vmem:[%s4602_s1 + $0x70] ss:$8 sps:$4 sm:$0xff]   ;;  %v3671_v2 = vmov 0   ;;  %s4616_s29 = smov (!%p433_p3, %s3086_s29), 63  ;;  %v495_v53 = vlaneseq }
   0xc   : > { %713 = vmatprep.mubr.bf16.mxu0 %v3671_v2  ;;  %681 = vmatprep.subr.bf16.mxu0 %v3471_v0  ;;  %v3474_v3 = vld [vmem:[%s4602_s1 + $0x64] ss:$8 sps:$4 sm:$0xff]   ;;  %v3476_v4 = vld [vmem:[%s4602_s1 + $0x60] ss:$8 sps:$4 sm:$0xff]   ;;  %v3477_v5 = vld [vmem:[%s4602_s1 + $0x54] ss:$8 sps:$4 sm:$0xff]  }
   0xd   : > { %682 = vmatpush1.bf16.msra.mxu0 %v3473_v1  ;;  %s3087_s21 = sshll.u32 %s4616_s29, 2  ;;  %v3479_v6 = vld [vmem:[%s4602_s1 + $0x50] ss:$8 sps:$4 sm:$0xff]   ;;  %v3480_v7 = vld [vmem:[%s4602_s1 + $0x44] ss:$8 sps:$4 sm:$0xff]   ;;  %v496_v54 = vshrl.u32 %v495_v53, 7 }
   0xe   : > { %683 = vmatprep.subr.bf16.mxu0 %v3474_v3  ;;  %s3778_s30 = scalar_lea.vmem %s4601_s0, %s3087_s21  ;;  %v3482_v8 = vld [vmem:[%s4602_s1 + $0x40] ss:$8 sps:$4 sm:$0xff]   ;;  %v3483_v9 = vld [vmem:[%s4602_s1 + $0x34] ss:$8 sps:$4 sm:$0xff]   ;;  %v3485_v10 = vld [vmem:[%s4602_s1 + $0x30] ss:$8 sps:$4 sm:$0xff]  }
   0xf   : > { %v3486_v11 = vld [vmem:[%s4602_s1 + $0x24] ss:$8 sps:$4 sm:$0xff]   ;;  %v3488_v12 = vld [vmem:[%s4602_s1 + $0x20] ss:$8 sps:$4 sm:$0xff]   ;;  %v3489_v13 = vld [vmem:[%s4602_s1 + $0x14] ss:$8 sps:$4 sm:$0xff]  }
  0x10   : > { %v3491_v14 = vld [vmem:[%s4602_s1 + $0x10] ss:$8 sps:$4 sm:$0xff]   ;;  %v3492_v15 = vld [vmem:[%s4602_s1 + $0x4] ss:$8 sps:$4 sm:$0xff]   ;;  %v3494_v16 = vld [vmem:[%s4602_s1] ss:$8 sps:$4 sm:$0xff]  }
  0x11   : > { %684 = vmatpush1.bf16.msra.mxu0 %v3476_v4  ;;  %v3511_v17 = vld [vmem:[%s4604_s3 + $0x78] sm:$0xff]   ;;  %v3495_v18 = vld [vmem:[%s3778_s30] sm:$0xff]   ;;  %v3513_v20 = vld [vmem:[%s4604_s3 + $0x70] sm:$0xff]   ;;  %v3899_v55 = vsub.s32 1, %v496_v54  ;;  %v3901_v56 = vsub.s32 0, %v496_v54  ;;  %s3089_s15 = sshll.u32 %s4616_s29, 3 }
  0x12   : > { %685 = vmatprep.subr.bf16.mxu0 %v3477_v5  ;;  %v3512_v19 = vld [vmem:[%s4604_s3 + $0x38] sm:$0xff]   ;;  %3238 = vmatprep.subr.bf16.mxu1 %v3511_v17  ;;  %v3514_v21 = vld [vmem:[%s4604_s3 + $0x30] sm:$0xff]   ;;  %v3515_v22 = vld [vmem:[%s4604_s3 + $0x68] sm:$0xff]   ;;  %s4532_s19 = scalar_lea.vmem %s4614_s13, %s3089_s15 }
  0x13   : > { %3239 = vmatpush3.bf16.msra.mxu1 %v3512_v19  ;;  %v3516_v23 = vld [vmem:[%s4604_s3 + $0x28] sm:$0xff]   ;;  %v3517_v24 = vld [vmem:[%s4604_s3 + $0x60] sm:$0xff]   ;;  %v3519_v27 = vld [vmem:[%s4604_s3 + $0x58] sm:$0xff]  }
  0x14   : > { %3240 = vmatprep.subr.bf16.mxu1 %v3513_v20  ;;  %v3496_v25 = vld [vmem:[%s3778_s30 + $0x8] sm:$0xff]   ;;  %v3518_v26 = vld [vmem:[%s4604_s3 + $0x20] sm:$0xff]   ;;  %v3520_v28 = vld [vmem:[%s4604_s3 + $0x18] sm:$0xff]  }
  0x15   : > { %686 = vmatpush1.bf16.msra.mxu0 %v3479_v6  ;;  %v3497_v29 = vld [vmem:[%s3778_s30 + $0x10] sm:$0xff]   ;;  %v3498_v30 = vld [vmem:[%s3778_s30 + $0x18] sm:$0xff]   ;;  %v3499_v31 = vld [vmem:[%s3778_s30 + $0x20] sm:$0xff]  }
  0x16   : > { %687 = vmatprep.subr.bf16.mxu0 %v3480_v7  ;;  %v3500_v32 = vld [vmem:[%s3778_s30 + $0x28] sm:$0xff]   ;;  %v3501_v33 = vld [vmem:[%s3778_s30 + $0x30] sm:$0xff]   ;;  %v3502_v34 = vld [vmem:[%s3778_s30 + $0x38] sm:$0xff]  }
  0x17   : > { %3241 = vmatpush3.bf16.msra.mxu1 %v3514_v21  ;;  %v3503_v35 = vld [vmem:[%s3778_s30 + $0x40] sm:$0xff]   ;;  %v3521_v36 = vld [vmem:[%s4604_s3 + $0x50] sm:$0xff]   ;;  %v3504_v38 = vld [vmem:[%s3778_s30 + $0x48] sm:$0xff]  }
  0x18   : > { %3242 = vmatprep.subr.bf16.mxu1 %v3515_v22  ;;  %v3522_v37 = vld [vmem:[%s4604_s3 + $0x10] sm:$0xff]   ;;  %v3523_v39 = vld [vmem:[%s4604_s3 + $0x48] sm:$0xff]   ;;  %v3525_v41 = vld [vmem:[%s4604_s3 + $0x40] sm:$0xff]  }
  0x19   : > { %688 = vmatpush1.bf16.msra.mxu0 %v3482_v8  ;;  %v3524_v40 = vld [vmem:[%s4604_s3 + $0x8] sm:$0xff]   ;;  %v3526_v42 = vld [vmem:[%s4604_s3] sm:$0xff]   ;;  %v3505_v43 = vld [vmem:[%s3778_s30 + $0x50] sm:$0xff]  }
  0x1a   : > { %689 = vmatprep.subr.bf16.mxu0 %v3483_v9  ;;  %v3506_v44 = vld [vmem:[%s3778_s30 + $0x58] sm:$0xff]   ;;  %v3507_v45 = vld [vmem:[%s3778_s30 + $0x60] sm:$0xff]   ;;  %v3508_v46 = vld [vmem:[%s3778_s30 + $0x68] sm:$0xff]  }
  0x1b   : > { %3243 = vmatpush3.bf16.msra.mxu1 %v3516_v23  ;;  %v3509_v47 = vld [vmem:[%s3778_s30 + $0x70] sm:$0xff]   ;;  %v3510_v48 = vld [vmem:[%s3778_s30 + $0x78] sm:$0xff]   ;;  %v3530_v51 = vld [vmem:[%s4606_s5 + $0x60] ss:$8 sps:$4 sm:$0xff]  }
  0x1c   : > { %3244 = vmatprep.subr.bf16.mxu1 %v3517_v24  ;;  %v3527_v49 = vld [vmem:[%s4606_s5 + $0x70] ss:$8 sps:$4 sm:$0xff]   ;;  %v3529_v50 = vld [vmem:[%s4606_s5 + $0x74] ss:$8 sps:$4 sm:$0xff]   ;;  %v3532_v52 = vld [vmem:[%s4606_s5 + $0x64] ss:$8 sps:$4 sm:$0xff]  }
  0x1d   : > { %690 = vmatpush1.bf16.msra.mxu0 %v3485_v10  ;;  %v493_v57 = vld [vmem:[%s4603_s2] sm:$0x3]  ;;  %v3533_v60 = vld [vmem:[%s4606_s5 + $0x50] ss:$8 sps:$4 sm:$0xff]   ;;  %v3535_v61 = vld [vmem:[%s4606_s5 + $0x54] ss:$8 sps:$4 sm:$0xff]  }
  0x1e   : > { %691 = vmatprep.subr.bf16.mxu0 %v3486_v11  ;;  %v3907_v59 = vrot.slane %v493_v57, %v3899_v55  ;;  %v3916_v62 = vrot.slane %v493_v57, %v3901_v56  ;;  %v3536_v6 = vld [vmem:[%s4606_s5 + $0x40] ss:$8 sps:$4 sm:$0xff]   ;;  %v3538_v7 = vld [vmem:[%s4606_s5 + $0x44] ss:$8 sps:$4 sm:$0xff]   ;;  %v3541_v9 = vld [vmem:[%s4606_s5 + $0x34] ss:$8 sps:$4 sm:$0xff]  }
  0x1f   : > { %3245 = vmatpush3.bf16.msra.mxu1 %v3518_v26  ;;  %v3544_v17 = vld [vmem:[%s4606_s5 + $0x24] ss:$8 sps:$4 sm:$0xff]   ;;  %v3542_v23 = vld [vmem:[%s4606_s5 + $0x20] ss:$8 sps:$4 sm:$0xff]   ;;  %v3547_v26 = vld [vmem:[%s4606_s5 + $0x14] ss:$8 sps:$4 sm:$0xff]  }
  0x20   : > { %3246 = vmatprep.subr.bf16.mxu1 %v3519_v27 }
  0x21   : > { %692 = vmatpush1.bf16.msra.mxu0 %v3488_v12 }
  0x22   : > { %693 = vmatprep.subr.bf16.mxu0 %v3489_v13 }
  0x23   : > { %3247 = vmatpush3.bf16.msra.mxu1 %v3520_v28 }
  0x24   : > { %3248 = vmatprep.subr.bf16.mxu1 %v3521_v36 }
  0x25   : > { %694 = vmatpush1.bf16.msra.mxu0 %v3491_v14  ;;  %v3539_v14 = vld [vmem:[%s4606_s5 + $0x30] ss:$8 sps:$4 sm:$0xff]  }
  0x26   : > { %695 = vmatprep.subr.bf16.mxu0 %v3492_v15 }
  0x27   : > { %3249 = vmatpush3.bf16.msra.mxu1 %v3522_v37 }
  0x28   : > { %3250 = vmatprep.subr.bf16.mxu1 %v3523_v39 }
  0x29   : > { %696 = vmatpush1.bf16.msra.mxu0 %v3494_v16 }
  0x2a   : > { %1422 = vmatprep.subr.bf16.mxu0 %v3529_v50 }
  0x2b   : > { %3251 = vmatpush3.bf16.msra.mxu1 %v3524_v40 }
  0x2c   : > { %714 = vmatmul.mubr.bf16.vlgmr.msra.gmra.mxu0 %v3495_v18  ;;  %3252 = vmatprep.subr.bf16.mxu1 %v3525_v41  ;;  %v3548_v41 = vld [vmem:[%s4606_s5] ss:$8 sps:$4 sm:$0xff]  }
  0x2d   : > { %723 = vmatprep.mubr.bf16.mxu0 %v3671_v2  ;;  %1423 = vmatpush1.bf16.msra.mxu0 %v3527_v49 }
  0x2e   : > { %1424 = vmatprep.subr.bf16.mxu0 %v3532_v52 }
  0x2f   : > { %3253 = vmatpush3.bf16.msra.mxu1 %v3526_v42 }
  0x31   : > { %1425 = vmatpush1.bf16.msra.mxu0 %v3530_v51 }
  0x32   : > { %1426 = vmatprep.subr.bf16.mxu0 %v3535_v61 }
  0x34   : > { %724 = vmatmul.mubr.bf16.gmra.mxu0 %v3496_v25 }
  0x35   : > { %733 = vmatprep.mubr.bf16.mxu0 %v3671_v2  ;;  %1427 = vmatpush1.bf16.msra.mxu0 %v3533_v60 }
  0x36   : > { %1428 = vmatprep.subr.bf16.mxu0 %v3538_v7 }
  0x39   : > { %1429 = vmatpush1.bf16.msra.mxu0 %v3536_v6 }
  0x3a   : > { %1430 = vmatprep.subr.bf16.mxu0 %v3541_v9 }
  0x3c   : > { %734 = vmatmul.mubr.bf16.gmra.mxu0 %v3497_v29 }
  0x3d   : > { %743 = vmatprep.mubr.bf16.mxu0 %v3671_v2  ;;  %1431 = vmatpush1.bf16.msra.mxu0 %v3539_v14 }
  0x3e   : > { %1432 = vmatprep.subr.bf16.mxu0 %v3544_v17 }
  0x41   : > { %1433 = vmatpush1.bf16.msra.mxu0 %v3542_v23 }
  0x42   : > { %1434 = vmatprep.subr.bf16.mxu0 %v3547_v26 }
  0x44   : > { %744 = vmatmul.mubr.bf16.gmra.mxu0 %v3498_v30 }
  0x45   : > { %753 = vmatprep.mubr.bf16.mxu0 %v3671_v2 }
  0x4c   : > { %754 = vmatmul.mubr.bf16.gmra.mxu0 %v3499_v31 }
  0x4d   : > { %763 = vmatprep.mubr.bf16.mxu0 %v3671_v2 }
  0x54   : > { %764 = vmatmul.mubr.bf16.gmra.mxu0 %v3500_v32  ;;  %v3545_v32 = vld [vmem:[%s4606_s5 + $0x10] ss:$8 sps:$4 sm:$0xff]  }
  0x55   : > { %773 = vmatprep.mubr.bf16.mxu0 %v3671_v2  ;;  %1435 = vmatpush1.bf16.msra.mxu0 %v3545_v32 }
  0x5c   : > { %774 = vmatmul.mubr.bf16.gmra.mxu0 %v3501_v33 }
  0x5d   : > { %783 = vmatprep.mubr.bf16.mxu0 %v3671_v2 }
  0x64   : > { %784 = vmatmul.mubr.bf16.gmra.mxu0 %v3502_v34 }
  0x65   : > { %793 = vmatprep.mubr.bf16.mxu0 %v3671_v2 }
  0x6c   : > { %794 = vmatmul.mubr.bf16.gmra.mxu0 %v3503_v35  ;;  %v3550_v35 = vld [vmem:[%s4606_s5 + $0x4] ss:$8 sps:$4 sm:$0xff]  }
  0x6d   : > { %803 = vmatprep.mubr.bf16.mxu0 %v3671_v2  ;;  %1436 = vmatprep.subr.bf16.mxu0 %v3550_v35 }
  0x6e   : > { %1437 = vmatpush1.bf16.msra.mxu0 %v3548_v41 }
  0x74   : > { %804 = vmatmul.mubr.bf16.gmra.mxu0 %v3504_v38 }
  0x75   : > { %813 = vmatprep.mubr.bf16.mxu0 %v3671_v2 }
  0x7c   : > { %814 = vmatmul.mubr.bf16.gmra.mxu0 %v3505_v43 }
  0x7d   : > { %823 = vmatprep.mubr.bf16.mxu0 %v3671_v2 }
  0x84   : > { %824 = vmatmul.mubr.bf16.gmra.mxu0 %v3506_v44 }
  0x85   : > { %833 = vmatprep.mubr.bf16.mxu0 %v3671_v2 }
  0x8c   : > { %834 = vmatmul.mubr.bf16.gmra.mxu0 %v3507_v45 }
  0x8d   : > { %843 = vmatprep.mubr.bf16.mxu0 %v3671_v2 }
  0x94   : > { %844 = vmatmul.mubr.bf16.gmra.mxu0 %v3508_v46 }
  0x95   : > { %853 = vmatprep.mubr.bf16.mxu0 %v3671_v2 }
  0x9c   : > { %854 = vmatmul.mubr.bf16.gmra.mxu0 %v3509_v47 }
  0x9d   : > { %863 = vmatprep.mubr.bf16.mxu0 %v3671_v2 }
  0xa4   : > { %864 = vmatmul.mubr.bf16.gmra.mxu0 %v3510_v48 }
  0xa5   : > { %1454 = vmatprep.mubr.bf16.mxu0 %v3671_v2 }
  0xec   : > { %v715_v58 = vpop.f32.mrf.mxu0 }
  0xed   : > { %v716_v4 = vadd.f32 %v715_v58, %v3916_v62 }
  0xee   : > { %v717_v63 = vpop.f32.mrf.mxu0 }
  0xef   : > { %v718_v1 = vadd.f32 %v717_v63, %v3907_v59  ;;  %v874_v15 = vmax.f32 %v716_v4, 0.0 }
  0xf0   : > { %v719_v0 = vpop.f32.mrf.mxu0 }
  0xf1   : > { %v720_v3 = vadd.f32 %v719_v0, %v3916_v62  ;;  %v875_v12 = vmax.f32 %v718_v1, 0.0 }
  0xf2   : > { %v721_v5 = vpop.f32.mrf.mxu0 }
  0xf3   : > { %v722_v8 = vadd.f32 %v721_v5, %v3907_v59  ;;  %v876_v10 = vmax.f32 %v720_v3, 0.0 }
  0xf4   : > { %v725_v11 = vpop.f32.mrf.mxu0 }
  0xf5   : > { %v877_v13 = vmax.f32 %v722_v8, 0.0  ;;  %v938_v19 = vpack.c.bf16 %v876_v10, %v874_v15  ;;  %v726_v24 = vadd.f32 %v725_v11, %v3916_v62 }
  0xf6   : > { %v727_v16 = vpop.f32.mrf.mxu0 }
  0xf7   : > { %v939_v18 = vpack.c.bf16 %v877_v13, %v875_v12  ;;  %v728_v21 = vadd.f32 %v727_v16, %v3907_v59  ;;  %v878_v33 = vmax.f32 %v726_v24, 0.0 }
  0xf8   : > { %v729_v20 = vpop.f32.mrf.mxu0 }
  0xf9   : > { %v730_v22 = vadd.f32 %v729_v20, %v3916_v62  ;;  %1137 = vmatprep.mubr.bf16.mxu1 %v939_v18  ;;  %v879_v30 = vmax.f32 %v728_v21, 0.0 }
  0xfa   : > { %v731_v25 = vpop.f32.mrf.mxu0  ;;  %1138 = vmatmul.mubr.bf16.vlgmr.msra.gmra.mxu1 %v938_v19 }
  0xfb   : > { %v732_v27 = vadd.f32 %v731_v25, %v3907_v59  ;;  %v880_v28 = vmax.f32 %v730_v22, 0.0 }
  0xfc   : > { %v735_v29 = vpop.f32.mrf.mxu0 }
  0xfd   : > { %v881_v31 = vmax.f32 %v732_v27, 0.0  ;;  %v940_v37 = vpack.c.bf16 %v880_v28, %v878_v33  ;;  %v736_v42 = vadd.f32 %v735_v29, %v3916_v62 }
  0xfe   : > { %v737_v34 = vpop.f32.mrf.mxu0 }
  0xff   : > { %v941_v36 = vpack.c.bf16 %v881_v31, %v879_v30  ;;  %v738_v39 = vadd.f32 %v737_v34, %v3907_v59  ;;  %v882_v49 = vmax.f32 %v736_v42, 0.0 }
 0x100   : > { %v739_v38 = vpop.f32.mrf.mxu0 }
 0x101   : > { %v740_v40 = vadd.f32 %v739_v38, %v3916_v62  ;;  %1145 = vmatprep.mubr.bf16.mxu1 %v941_v36  ;;  %v883_v47 = vmax.f32 %v738_v39, 0.0 }
 0x102   : > { %v741_v43 = vpop.f32.mrf.mxu0  ;;  %1146 = vmatmul.mubr.bf16.gmra.mxu1 %v940_v37 }
 0x103   : > { %v742_v44 = vadd.f32 %v741_v43, %v3907_v59  ;;  %v884_v45 = vmax.f32 %v740_v40, 0.0 }
 0x104   : > { %v745_v46 = vpop.f32.mrf.mxu0 }
 0x105   : > { %v885_v48 = vmax.f32 %v742_v44, 0.0  ;;  %v942_v52 = vpack.c.bf16 %v884_v45, %v882_v49  ;;  %v746_v58 = vadd.f32 %v745_v46, %v3916_v62 }
 0x106   : > { %v747_v50 = vpop.f32.mrf.mxu0 }
 0x107   : > { %v943_v51 = vpack.c.bf16 %v885_v48, %v883_v47  ;;  %v748_v54 = vadd.f32 %v747_v50, %v3907_v59  ;;  %v886_v4 = vmax.f32 %v746_v58, 0.0 }
 0x108   : > { %v749_v53 = vpop.f32.mrf.mxu0 }
 0x109   : > { %v750_v57 = vadd.f32 %v749_v53, %v3916_v62  ;;  %1153 = vmatprep.mubr.bf16.mxu1 %v943_v51  ;;  %v887_v1 = vmax.f32 %v748_v54, 0.0 }
 0x10a   : > { %v751_v60 = vpop.f32.mrf.mxu0  ;;  %1154 = vmatmul.mubr.bf16.gmra.mxu1 %v942_v52 }
 0x10b   : > { %v752_v61 = vadd.f32 %v751_v60, %v3907_v59  ;;  %v888_v63 = vmax.f32 %v750_v57, 0.0 }
 0x10c   : > { %v755_v0 = vpop.f32.mrf.mxu0 }
 0x10d   : > { %v889_v3 = vmax.f32 %v752_v61, 0.0  ;;  %v944_v7 = vpack.c.bf16 %v888_v63, %v886_v4  ;;  %v756_v11 = vadd.f32 %v755_v0, %v3916_v62 }
 0x10e   : > { %v757_v5 = vpop.f32.mrf.mxu0 }
 0x10f   : > { %v945_v6 = vpack.c.bf16 %v889_v3, %v887_v1  ;;  %v758_v9 = vadd.f32 %v757_v5, %v3907_v59  ;;  %v890_v18 = vmax.f32 %v756_v11, 0.0 }
 0x110   : > { %v759_v8 = vpop.f32.mrf.mxu0 }
 0x111   : > { %v760_v10 = vadd.f32 %v759_v8, %v3916_v62  ;;  %1161 = vmatprep.mubr.bf16.mxu1 %v945_v6  ;;  %v891_v16 = vmax.f32 %v758_v9, 0.0 }
 0x112   : > { %v761_v12 = vpop.f32.mrf.mxu0  ;;  %1162 = vmatmul.mubr.bf16.gmra.mxu1 %v944_v7 }
 0x113   : > { %v762_v13 = vadd.f32 %v761_v12, %v3907_v59  ;;  %v892_v14 = vmax.f32 %v760_v10, 0.0 }
 0x114   : > { %v765_v15 = vpop.f32.mrf.mxu0 }
 0x115   : > { %v893_v17 = vmax.f32 %v762_v13, 0.0  ;;  %v946_v21 = vpack.c.bf16 %v892_v14, %v890_v18  ;;  %v766_v25 = vadd.f32 %v765_v15, %v3916_v62 }
 0x116   : > { %v767_v19 = vpop.f32.mrf.mxu0 }
 0x117   : > { %v947_v20 = vpack.c.bf16 %v893_v17, %v891_v16  ;;  %v768_v23 = vadd.f32 %v767_v19, %v3907_v59  ;;  %v894_v32 = vmax.f32 %v766_v25, 0.0 }
 0x118   : > { %v769_v22 = vpop.f32.mrf.mxu0 }
 0x119   : > { %v770_v24 = vadd.f32 %v769_v22, %v3916_v62  ;;  %1169 = vmatprep.mubr.bf16.mxu1 %v947_v20  ;;  %v895_v30 = vmax.f32 %v768_v23, 0.0 }
 0x11a   : > { %v771_v26 = vpop.f32.mrf.mxu0  ;;  %1170 = vmatmul.mubr.bf16.gmra.mxu1 %v946_v21 }
 0x11b   : > { %v772_v27 = vadd.f32 %v771_v26, %v3907_v59  ;;  %v896_v28 = vmax.f32 %v770_v24, 0.0 }
 0x11c   : > { %v775_v29 = vpop.f32.mrf.mxu0 }
 0x11d   : > { %v897_v31 = vmax.f32 %v772_v27, 0.0  ;;  %v948_v35 = vpack.c.bf16 %v896_v28, %v894_v32  ;;  %v776_v39 = vadd.f32 %v775_v29, %v3916_v62 }
 0x11e   : > { %v777_v33 = vpop.f32.mrf.mxu0 }
 0x11f   : > { %v949_v34 = vpack.c.bf16 %v897_v31, %v895_v30  ;;  %v778_v37 = vadd.f32 %v777_v33, %v3907_v59  ;;  %v898_v46 = vmax.f32 %v776_v39, 0.0 }
 0x120   : > { %v779_v36 = vpop.f32.mrf.mxu0 }
 0x121   : > { %v780_v38 = vadd.f32 %v779_v36, %v3916_v62  ;;  %1177 = vmatprep.mubr.bf16.mxu1 %v949_v34  ;;  %v899_v44 = vmax.f32 %v778_v37, 0.0 }
 0x122   : > { %v781_v40 = vpop.f32.mrf.mxu0  ;;  %1178 = vmatmul.mubr.bf16.gmra.mxu1 %v948_v35 }
 0x123   : > { %v782_v41 = vadd.f32 %v781_v40, %v3907_v59  ;;  %v900_v42 = vmax.f32 %v780_v38, 0.0 }
 0x124   : > { %v785_v43 = vpop.f32.mrf.mxu0 }
 0x125   : > { %v901_v45 = vmax.f32 %v782_v41, 0.0  ;;  %v950_v49 = vpack.c.bf16 %v900_v42, %v898_v46  ;;  %v786_v53 = vadd.f32 %v785_v43, %v3916_v62 }
 0x126   : > { %v787_v47 = vpop.f32.mrf.mxu0 }
 0x127   : > { %v951_v48 = vpack.c.bf16 %v901_v45, %v899_v44  ;;  %v788_v51 = vadd.f32 %v787_v47, %v3907_v59  ;;  %v902_v0 = vmax.f32 %v786_v53, 0.0 }
 0x128   : > { %v789_v50 = vpop.f32.mrf.mxu0 }
 0x129   : > { %v790_v52 = vadd.f32 %v789_v50, %v3916_v62  ;;  %1185 = vmatprep.mubr.bf16.mxu1 %v951_v48  ;;  %v903_v61 = vmax.f32 %v788_v51, 0.0 }
 0x12a   : > { %v791_v54 = vpop.f32.mrf.mxu0  ;;  %1186 = vmatmul.mubr.bf16.gmra.mxu1 %v950_v49 }
 0x12b   : > { %v792_v57 = vadd.f32 %v791_v54, %v3907_v59  ;;  %v904_v58 = vmax.f32 %v790_v52, 0.0 }
 0x12c   : > { %v795_v60 = vpop.f32.mrf.mxu0 }
 0x12d   : > { %v905_v63 = vmax.f32 %v792_v57, 0.0  ;;  %v952_v4 = vpack.c.bf16 %v904_v58, %v902_v0  ;;  %v796_v8 = vadd.f32 %v795_v60, %v3916_v62 }
 0x12e   : > { %v797_v1 = vpop.f32.mrf.mxu0 }
 0x12f   : > { %v953_v3 = vpack.c.bf16 %v905_v63, %v903_v61  ;;  %v798_v6 = vadd.f32 %v797_v1, %v3907_v59  ;;  %v906_v15 = vmax.f32 %v796_v8, 0.0 }
 0x130   : > { %v799_v5 = vpop.f32.mrf.mxu0 }
 0x131   : > { %v800_v7 = vadd.f32 %v799_v5, %v3916_v62  ;;  %1193 = vmatprep.mubr.bf16.mxu1 %v953_v3  ;;  %v907_v13 = vmax.f32 %v798_v6, 0.0 }
 0x132   : > { %v801_v9 = vpop.f32.mrf.mxu0  ;;  %1194 = vmatmul.mubr.bf16.gmra.mxu1 %v952_v4 }
 0x133   : > { %v802_v10 = vadd.f32 %v801_v9, %v3907_v59  ;;  %v908_v11 = vmax.f32 %v800_v7, 0.0 }
 0x134   : > { %v805_v12 = vpop.f32.mrf.mxu0 }
 0x135   : > { %v909_v14 = vmax.f32 %v802_v10, 0.0  ;;  %v954_v18 = vpack.c.bf16 %v908_v11, %v906_v15  ;;  %v806_v22 = vadd.f32 %v805_v12, %v3916_v62 }
 0x136   : > { %v807_v16 = vpop.f32.mrf.mxu0 }
 0x137   : > { %v955_v17 = vpack.c.bf16 %v909_v14, %v907_v13  ;;  %v808_v20 = vadd.f32 %v807_v16, %v3907_v59  ;;  %v910_v29 = vmax.f32 %v806_v22, 0.0 }
 0x138   : > { %v809_v19 = vpop.f32.mrf.mxu0 }
 0x139   : > { %v810_v21 = vadd.f32 %v809_v19, %v3916_v62  ;;  %1201 = vmatprep.mubr.bf16.mxu1 %v955_v17  ;;  %v911_v27 = vmax.f32 %v808_v20, 0.0 }
 0x13a   : > { %v811_v23 = vpop.f32.mrf.mxu0  ;;  %1202 = vmatmul.mubr.bf16.gmra.mxu1 %v954_v18 }
 0x13b   : > { %v812_v24 = vadd.f32 %v811_v23, %v3907_v59  ;;  %v912_v25 = vmax.f32 %v810_v21, 0.0 }
 0x13c   : > { %v815_v26 = vpop.f32.mrf.mxu0 }
 0x13d   : > { %v913_v28 = vmax.f32 %v812_v24, 0.0  ;;  %v956_v32 = vpack.c.bf16 %v912_v25, %v910_v29  ;;  %v816_v36 = vadd.f32 %v815_v26, %v3916_v62 }
 0x13e   : > { %v817_v30 = vpop.f32.mrf.mxu0 }
 0x13f   : > { %v957_v31 = vpack.c.bf16 %v913_v28, %v911_v27  ;;  %v818_v34 = vadd.f32 %v817_v30, %v3907_v59  ;;  %v914_v43 = vmax.f32 %v816_v36, 0.0 }
 0x140   : > { %v819_v33 = vpop.f32.mrf.mxu0 }
 0x141   : > { %v820_v35 = vadd.f32 %v819_v33, %v3916_v62  ;;  %1209 = vmatprep.mubr.bf16.mxu1 %v957_v31  ;;  %v915_v41 = vmax.f32 %v818_v34, 0.0 }
 0x142   : > { %v821_v37 = vpop.f32.mrf.mxu0  ;;  %1210 = vmatmul.mubr.bf16.gmra.mxu1 %v956_v32 }
 0x143   : > { %v822_v38 = vadd.f32 %v821_v37, %v3907_v59  ;;  %v916_v39 = vmax.f32 %v820_v35, 0.0 }
 0x144   : > { %v825_v40 = vpop.f32.mrf.mxu0 }
 0x145   : > { %v917_v42 = vmax.f32 %v822_v38, 0.0  ;;  %v958_v46 = vpack.c.bf16 %v916_v39, %v914_v43  ;;  %v826_v50 = vadd.f32 %v825_v40, %v3916_v62 }
 0x146   : > { %v827_v44 = vpop.f32.mrf.mxu0 }
 0x147   : > { %v959_v45 = vpack.c.bf16 %v917_v42, %v915_v41  ;;  %v828_v48 = vadd.f32 %v827_v44, %v3907_v59  ;;  %v918_v60 = vmax.f32 %v826_v50, 0.0 }
 0x148   : > { %v829_v47 = vpop.f32.mrf.mxu0 }
 0x149   : > { %v830_v49 = vadd.f32 %v829_v47, %v3916_v62  ;;  %1217 = vmatprep.mubr.bf16.mxu1 %v959_v45  ;;  %v919_v57 = vmax.f32 %v828_v48, 0.0 }
 0x14a   : > { %v831_v51 = vpop.f32.mrf.mxu0  ;;  %1218 = vmatmul.mubr.bf16.gmra.mxu1 %v958_v46 }
 0x14b   : > { %v832_v52 = vadd.f32 %v831_v51, %v3907_v59  ;;  %v920_v53 = vmax.f32 %v830_v49, 0.0 }
 0x14c   : > { %v835_v54 = vpop.f32.mrf.mxu0 }
 0x14d   : > { %v921_v58 = vmax.f32 %v832_v52, 0.0  ;;  %v960_v0 = vpack.c.bf16 %v920_v53, %v918_v60  ;;  %v836_v5 = vadd.f32 %v835_v54, %v3916_v62  ;;  %v3556_v60 = vld [vmem:[%s4608_s7 + $0x64] ss:$8 sps:$4 sm:$0xff]  }
 0x14e   : > { %v837_v61 = vpop.f32.mrf.mxu0 }
 0x14f   : > { %v961_v63 = vpack.c.bf16 %v921_v58, %v919_v57  ;;  %v838_v3 = vadd.f32 %v837_v61, %v3907_v59  ;;  %v922_v12 = vmax.f32 %v836_v5, 0.0  ;;  %v3551_v58 = vld [vmem:[%s4608_s7 + $0x70] ss:$8 sps:$4 sm:$0xff]  }
 0x150   : > { %v839_v1 = vpop.f32.mrf.mxu0  ;;  %v3557_v61 = vld [vmem:[%s4608_s7 + $0x50] ss:$8 sps:$4 sm:$0xff]  }
 0x151   : > { %v840_v4 = vadd.f32 %v839_v1, %v3916_v62  ;;  %1225 = vmatprep.mubr.bf16.mxu1 %v961_v63  ;;  %v923_v10 = vmax.f32 %v838_v3, 0.0  ;;  %v3559_v63 = vld [vmem:[%s4608_s7 + $0x54] ss:$8 sps:$4 sm:$0xff]   ;;  %v3562_v1 = vld [vmem:[%s4608_s7 + $0x44] ss:$8 sps:$4 sm:$0xff]  }
 0x152   : > { %v841_v6 = vpop.f32.mrf.mxu0  ;;  %1226 = vmatmul.mubr.bf16.gmra.mxu1 %v960_v0  ;;  %v3560_v0 = vld [vmem:[%s4608_s7 + $0x40] ss:$8 sps:$4 sm:$0xff]   ;;  %v3563_v3 = vld [vmem:[%s4608_s7 + $0x30] ss:$8 sps:$4 sm:$0xff]  }
 0x153   : > { %v842_v7 = vadd.f32 %v841_v6, %v3907_v59  ;;  %v924_v8 = vmax.f32 %v840_v4, 0.0  ;;  %v3565_v4 = vld [vmem:[%s4608_s7 + $0x34] ss:$8 sps:$4 sm:$0xff]  }
 0x154   : > { %v845_v9 = vpop.f32.mrf.mxu0 }
 0x155   : > { %v925_v11 = vmax.f32 %v842_v7, 0.0  ;;  %v962_v15 = vpack.c.bf16 %v924_v8, %v922_v12  ;;  %v846_v19 = vadd.f32 %v845_v9, %v3916_v62  ;;  %v4045_v8 = vld [vmem:[%s4605_s4] ss:$0 sm:$0xff] }
 0x156   : > { %v847_v13 = vpop.f32.mrf.mxu0 }
 0x157   : > { %v963_v14 = vpack.c.bf16 %v925_v11, %v923_v10  ;;  %v848_v17 = vadd.f32 %v847_v13, %v3907_v59  ;;  %v926_v26 = vmax.f32 %v846_v19, 0.0  ;;  %v3566_v10 = vld [vmem:[%s4608_s7 + $0x20] ss:$8 sps:$4 sm:$0xff]   ;;  %v3568_v11 = vld [vmem:[%s4608_s7 + $0x24] ss:$8 sps:$4 sm:$0xff]  }
 0x158   : > { %v849_v16 = vpop.f32.mrf.mxu0  ;;  %v3574_v19 = vld [vmem:[%s4608_s7 + $0x4] ss:$8 sps:$4 sm:$0xff]  }
 0x159   : > { %v850_v18 = vadd.f32 %v849_v16, %v3916_v62  ;;  %1233 = vmatprep.mubr.bf16.mxu1 %v963_v14  ;;  %v927_v24 = vmax.f32 %v848_v17, 0.0  ;;  %v3569_v17 = vld [vmem:[%s4608_s7 + $0x10] ss:$8 sps:$4 sm:$0xff]  }
 0x15a   : > { %v851_v20 = vpop.f32.mrf.mxu0  ;;  %1234 = vmatmul.mubr.bf16.gmra.mxu1 %v962_v15  ;;  %v3571_v15 = vld [vmem:[%s4608_s7 + $0x14] ss:$8 sps:$4 sm:$0xff]  }
 0x15b   : > { %v852_v21 = vadd.f32 %v851_v20, %v3907_v59  ;;  %v928_v22 = vmax.f32 %v850_v18, 0.0 }
 0x15c   : > { %v855_v23 = vpop.f32.mrf.mxu0 }
 0x15d   : > { %v929_v25 = vmax.f32 %v852_v21, 0.0  ;;  %v964_v29 = vpack.c.bf16 %v928_v22, %v926_v26  ;;  %v856_v33 = vadd.f32 %v855_v23, %v3916_v62 }
 0x15e   : > { %v857_v27 = vpop.f32.mrf.mxu0 }
 0x15f   : > { %v965_v28 = vpack.c.bf16 %v929_v25, %v927_v24  ;;  %v858_v31 = vadd.f32 %v857_v27, %v3907_v59  ;;  %v930_v40 = vmax.f32 %v856_v33, 0.0  ;;  %v3572_v25 = vld [vmem:[%s4608_s7] ss:$8 sps:$4 sm:$0xff]   ;;  %v3577_v27 = vld [vmem:[%s4608_s7 + $0xf4] ss:$8 sps:$4 sm:$0xff]  }
 0x160   : > { %v859_v30 = vpop.f32.mrf.mxu0 }
 0x161   : > { %v860_v32 = vadd.f32 %v859_v30, %v3916_v62  ;;  %1241 = vmatprep.mubr.bf16.mxu1 %v965_v28  ;;  %v931_v38 = vmax.f32 %v858_v31, 0.0 }
 0x162   : > { %v861_v34 = vpop.f32.mrf.mxu0  ;;  %1242 = vmatmul.mubr.bf16.gmra.mxu1 %v964_v29 }
 0x163   : > { %v862_v35 = vadd.f32 %v861_v34, %v3907_v59  ;;  %v932_v36 = vmax.f32 %v860_v32, 0.0  ;;  %v3575_v32 = vld [vmem:[%s4608_s7 + $0xf0] ss:$8 sps:$4 sm:$0xff]   ;;  %v3580_v34 = vld [vmem:[%s4608_s7 + $0xe4] ss:$8 sps:$4 sm:$0xff]  }
 0x164   : > { %v865_v37 = vpop.f32.mrf.mxu0 }
 0x165   : > { %v933_v39 = vmax.f32 %v862_v35, 0.0  ;;  %v966_v43 = vpack.c.bf16 %v932_v36, %v930_v40  ;;  %v866_v47 = vadd.f32 %v865_v37, %v3916_v62  ;;  %v3578_v40 = vld [vmem:[%s4608_s7 + $0xe0] ss:$8 sps:$4 sm:$0xff]  }
 0x166   : > { %v867_v41 = vpop.f32.mrf.mxu0 }
 0x167   : > { %v967_v42 = vpack.c.bf16 %v933_v39, %v931_v38  ;;  %v868_v45 = vadd.f32 %v867_v41, %v3907_v59  ;;  %v934_v53 = vmax.f32 %v866_v47, 0.0  ;;  %v3581_v47 = vld [vmem:[%s4608_s7 + $0xd0] ss:$8 sps:$4 sm:$0xff]  }
 0x168   : > { %v869_v44 = vpop.f32.mrf.mxu0 }
 0x169   : > { %v870_v46 = vadd.f32 %v869_v44, %v3916_v62  ;;  %1249 = vmatprep.mubr.bf16.mxu1 %v967_v42  ;;  %v935_v51 = vmax.f32 %v868_v45, 0.0  ;;  %v3553_v62 = vld [vmem:[%s4608_s7 + $0x74] ss:$8 sps:$4 sm:$0xff]  }
 0x16a   : > { %v871_v48 = vpop.f32.mrf.mxu0  ;;  %1250 = vmatmul.mubr.bf16.gmra.mxu1 %v966_v43  ;;  %1915 = vmatprep.subr.bf16.mxu1 %v3553_v62  ;;  %v3583_v42 = vld [vmem:[%s4608_s7 + $0xd4] ss:$8 sps:$4 sm:$0xff]  }
 0x16b   : > { %v872_v49 = vadd.f32 %v871_v48, %v3907_v59  ;;  %v936_v50 = vmax.f32 %v870_v46, 0.0  ;;  %1916 = vmatpush1.bf16.msra.mxu1 %v3551_v58  ;;  %v3554_v59 = vld [vmem:[%s4608_s7 + $0x60] ss:$8 sps:$4 sm:$0xff]   ;;  %v3589_v62 = vld [vmem:[%s4608_s7 + $0xb4] ss:$8 sps:$4 sm:$0xff]  }
 0x16c   : > { %1917 = vmatprep.subr.bf16.mxu1 %v3556_v60 }
 0x16d   : > { %v937_v52 = vmax.f32 %v872_v49, 0.0  ;;  %v968_v57 = vpack.c.bf16 %v936_v50, %v934_v53  ;;  %v3586_v49 = vld [vmem:[%s4608_s7 + $0xc4] ss:$8 sps:$4 sm:$0xff]  }
 0x16f   : > { %v969_v54 = vpack.c.bf16 %v937_v52, %v935_v51  ;;  %1918 = vmatpush1.bf16.msra.mxu1 %v3554_v59 }
 0x170   : > { %1919 = vmatprep.subr.bf16.mxu1 %v3559_v63 }
 0x171   : > { %1257 = vmatprep.mubr.bf16.mxu1 %v969_v54 }
 0x172   : > { %1258 = vmatmul.mubr.bf16.gmra.mxu1 %v968_v57  ;;  %v3584_v57 = vld [vmem:[%s4608_s7 + $0xc0] ss:$8 sps:$4 sm:$0xff]  }
 0x173   : > { %1920 = vmatpush1.bf16.msra.mxu1 %v3557_v61 }
 0x174   : > { %1921 = vmatprep.subr.bf16.mxu1 %v3562_v1 }
 0x177   : > { %1922 = vmatpush1.bf16.msra.mxu1 %v3560_v0  ;;  %v3587_v0 = vld [vmem:[%s4608_s7 + $0xb0] ss:$8 sps:$4 sm:$0xff]  }
 0x178   : > { %1923 = vmatprep.subr.bf16.mxu1 %v3565_v4 }
 0x17b   : > { %1924 = vmatpush1.bf16.msra.mxu1 %v3563_v3  ;;  %v3592_v3 = vld [vmem:[%s4608_s7 + $0xa4] ss:$8 sps:$4 sm:$0xff]  }
 0x17c   : > { %1925 = vmatprep.subr.bf16.mxu1 %v3568_v11 }
 0x17f   : > { %1926 = vmatpush1.bf16.msra.mxu1 %v3566_v10  ;;  %v3590_v10 = vld [vmem:[%s4608_s7 + $0xa0] ss:$8 sps:$4 sm:$0xff]  }
 0x180   : > { %1927 = vmatprep.subr.bf16.mxu1 %v3571_v15 }
 0x183   : > { %1928 = vmatpush1.bf16.msra.mxu1 %v3569_v17  ;;  %v3593_v17 = vld [vmem:[%s4608_s7 + $0x90] ss:$8 sps:$4 sm:$0xff]  }
 0x184   : > { %1929 = vmatprep.subr.bf16.mxu1 %v3574_v19 }
 0x187   : > { %1930 = vmatpush1.bf16.msra.mxu1 %v3572_v25 }
 0x188   : > { %1931 = vmatprep.subr.bf16.mxu1 %v3577_v27 }
 0x18b   : > { %1932 = vmatpush2.bf16.msra.mxu1 %v3575_v32 }
 0x18c   : > { %1933 = vmatprep.subr.bf16.mxu1 %v3580_v34 }
 0x18f   : > { %1934 = vmatpush2.bf16.msra.mxu1 %v3578_v40 }
 0x190   : > { %1935 = vmatprep.subr.bf16.mxu1 %v3583_v42 }
 0x193   : > { %1936 = vmatpush2.bf16.msra.mxu1 %v3581_v47 }
 0x194   : > { %1937 = vmatprep.subr.bf16.mxu1 %v3586_v49 }
 0x197   : > { %1938 = vmatpush2.bf16.msra.mxu1 %v3584_v57 }
 0x198   : > { %1939 = vmatprep.subr.bf16.mxu1 %v3589_v62 }
 0x19b   : > { %1940 = vmatpush2.bf16.msra.mxu1 %v3587_v0 }
 0x19c   : > { %1941 = vmatprep.subr.bf16.mxu1 %v3592_v3 }
 0x19f   : > { %1942 = vmatpush2.bf16.msra.mxu1 %v3590_v10 }
 0x1ba   : > { %v3254_v5 = vpop.f32.mrf.mxu1 }
 0x1bc   : > { %v3255_v6 = vpop.f32.mrf.mxu1 }
 0x1bd   : > { %v3256_v7 = vadd.f32 %v3255_v6, %v3254_v5 }
 0x1be   : > { %v3257_v9 = vpop.f32.mrf.mxu1 }
 0x1bf   : > { %v1140_v13 = vadd.f32 %v3256_v7, %v4045_v8 }
 0x1c0   : > { %v3258_v12 = vpop.f32.mrf.mxu1 }
 0x1c1   : > { %v3259_v14 = vadd.f32 %v3258_v12, %v3257_v9  ;;  %v1266_v21 = vmax.f32 %v1140_v13, 0.0  ;;  %v3595_v12 = vld [vmem:[%s4608_s7 + $0x94] ss:$8 sps:$4 sm:$0xff]  }
 0x1c2   : > { %v3260_v16 = vpop.f32.mrf.mxu1  ;;  %1943 = vmatprep.subr.bf16.mxu1 %v3595_v12 }
 0x1c3   : > { %v1143_v18 = vadd.f32 %v3259_v14, %v4045_v8  ;;  %1944 = vmatpush2.bf16.msra.mxu1 %v3593_v17 }
 0x1c4   : > { %v3261_v20 = vpop.f32.mrf.mxu1 }
 0x1c5   : > { %v1267_v22 = vmax.f32 %v1143_v18, 0.0  ;;  %v3262_v23 = vadd.f32 %v3261_v20, %v3260_v16 }
 0x1c6   : > { %v3263_v24 = vpop.f32.mrf.mxu1 }
 0x1c7   : > { %v1298_v26 = vpack.c.bf16 %v1267_v22, %v1266_v21  ;;  %v1148_v29 = vadd.f32 %v3262_v23, %v4045_v8 }
 0x1c8   : > { %v3264_v28 = vpop.f32.mrf.mxu1 }
 0x1c9   : > { %v3265_v30 = vadd.f32 %v3264_v28, %v3263_v24  ;;  %1455 = vmatmul.mubr.bf16.vlgmr.msra.gmra.mxu0 %v1298_v26  ;;  %v1268_v36 = vmax.f32 %v1148_v29, 0.0 }
 0x1ca   : > { %v3266_v31 = vpop.f32.mrf.mxu1  ;;  %1464 = vmatprep.mubr.bf16.mxu0 %v3671_v2 }
 0x1cb   : > { %v1151_v33 = vadd.f32 %v3265_v30, %v4045_v8 }
 0x1cc   : > { %v3267_v35 = vpop.f32.mrf.mxu1 }
 0x1cd   : > { %v1269_v37 = vmax.f32 %v1151_v33, 0.0  ;;  %v3268_v38 = vadd.f32 %v3267_v35, %v3266_v31 }
 0x1ce   : > { %v3269_v39 = vpop.f32.mrf.mxu1 }
 0x1cf   : > { %v1299_v41 = vpack.c.bf16 %v1269_v37, %v1268_v36  ;;  %v1156_v44 = vadd.f32 %v3268_v38, %v4045_v8 }
 0x1d0   : > { %v3270_v43 = vpop.f32.mrf.mxu1 }
 0x1d1   : > { %v3271_v45 = vadd.f32 %v3270_v43, %v3269_v39  ;;  %1465 = vmatmul.mubr.bf16.gmra.mxu0 %v1299_v41  ;;  %v1270_v51 = vmax.f32 %v1156_v44, 0.0 }
 0x1d2   : > { %v3272_v46 = vpop.f32.mrf.mxu1  ;;  %1474 = vmatprep.mubr.bf16.mxu0 %v3671_v2 }
 0x1d3   : > { %v1159_v48 = vadd.f32 %v3271_v45, %v4045_v8 }
 0x1d4   : > { %v3273_v50 = vpop.f32.mrf.mxu1 }
 0x1d5   : > { %v1271_v52 = vmax.f32 %v1159_v48, 0.0  ;;  %v3274_v53 = vadd.f32 %v3273_v50, %v3272_v46 }
 0x1d6   : > { %v3275_v54 = vpop.f32.mrf.mxu1 }
 0x1d7   : > { %v1300_v58 = vpack.c.bf16 %v1271_v52, %v1270_v51  ;;  %v1164_v60 = vadd.f32 %v3274_v53, %v4045_v8 }
 0x1d8   : > { %v3276_v59 = vpop.f32.mrf.mxu1 }
 0x1d9   : > { %v3277_v61 = vadd.f32 %v3276_v59, %v3275_v54  ;;  %1475 = vmatmul.mubr.bf16.gmra.mxu0 %v1300_v58  ;;  %v1272_v5 = vmax.f32 %v1164_v60, 0.0 }
 0x1da   : > { %v3278_v63 = vpop.f32.mrf.mxu1  ;;  %1484 = vmatprep.mubr.bf16.mxu0 %v3671_v2 }
 0x1db   : > { %v1167_v1 = vadd.f32 %v3277_v61, %v4045_v8 }
 0x1dc   : > { %v3279_v4 = vpop.f32.mrf.mxu1 }
 0x1dd   : > { %v1273_v6 = vmax.f32 %v1167_v1, 0.0  ;;  %v3280_v7 = vadd.f32 %v3279_v4, %v3278_v63 }
 0x1de   : > { %v3281_v9 = vpop.f32.mrf.mxu1 }
 0x1df   : > { %v1301_v11 = vpack.c.bf16 %v1273_v6, %v1272_v5  ;;  %v1172_v14 = vadd.f32 %v3280_v7, %v4045_v8 }
 0x1e0   : > { %v3282_v13 = vpop.f32.mrf.mxu1 }
 0x1e1   : > { %v3283_v15 = vadd.f32 %v3282_v13, %v3281_v9  ;;  %1485 = vmatmul.mubr.bf16.gmra.mxu0 %v1301_v11  ;;  %v1274_v20 = vmax.f32 %v1172_v14, 0.0 }
 0x1e2   : > { %v3284_v16 = vpop.f32.mrf.mxu1  ;;  %1494 = vmatprep.mubr.bf16.mxu0 %v3671_v2 }
 0x1e3   : > { %v1175_v18 = vadd.f32 %v3283_v15, %v4045_v8 }
 0x1e4   : > { %v3285_v19 = vpop.f32.mrf.mxu1 }
 0x1e5   : > { %v1275_v21 = vmax.f32 %v1175_v18, 0.0  ;;  %v3286_v22 = vadd.f32 %v3285_v19, %v3284_v16 }
 0x1e6   : > { %v3287_v23 = vpop.f32.mrf.mxu1 }
 0x1e7   : > { %v1302_v24 = vpack.c.bf16 %v1275_v21, %v1274_v20  ;;  %v1180_v26 = vadd.f32 %v3286_v22, %v4045_v8 }
 0x1e8   : > { %v3288_v25 = vpop.f32.mrf.mxu1 }
 0x1e9   : > { %v3289_v27 = vadd.f32 %v3288_v25, %v3287_v23  ;;  %1495 = vmatmul.mubr.bf16.gmra.mxu0 %v1302_v24  ;;  %v1276_v31 = vmax.f32 %v1180_v26, 0.0  ;;  %v3598_v23 = vld [vmem:[%s4608_s7 + $0x84] ss:$8 sps:$4 sm:$0xff]   ;;  %v3596_v25 = vld [vmem:[%s4608_s7 + $0x80] ss:$8 sps:$4 sm:$0xff]  }
 0x1ea   : > { %v3290_v28 = vpop.f32.mrf.mxu1  ;;  %1504 = vmatprep.mubr.bf16.mxu0 %v3671_v2  ;;  %1945 = vmatprep.subr.bf16.mxu1 %v3598_v23 }
 0x1eb   : > { %v1183_v29 = vadd.f32 %v3289_v27, %v4045_v8  ;;  %1946 = vmatpush2.bf16.msra.mxu1 %v3596_v25  ;;  %v3601_v25 = vld [vmem:[%s4610_s9 + $0x74] ss:$8 sps:$4 sm:$0xff]  }
 0x1ec   : > { %v3291_v30 = vpop.f32.mrf.mxu1  ;;  %2408 = vmatprep.subr.bf16.mxu0 %v3601_v25 }
 0x1ed   : > { %v1277_v32 = vmax.f32 %v1183_v29, 0.0  ;;  %v3292_v33 = vadd.f32 %v3291_v30, %v3290_v28 }
 0x1ee   : > { %v3293_v34 = vpop.f32.mrf.mxu1 }
 0x1ef   : > { %v1303_v35 = vpack.c.bf16 %v1277_v32, %v1276_v31  ;;  %v1188_v37 = vadd.f32 %v3292_v33, %v4045_v8 }
 0x1f0   : > { %v3294_v36 = vpop.f32.mrf.mxu1 }
 0x1f1   : > { %v3295_v38 = vadd.f32 %v3294_v36, %v3293_v34  ;;  %1505 = vmatmul.mubr.bf16.gmra.mxu0 %v1303_v35  ;;  %v1278_v42 = vmax.f32 %v1188_v37, 0.0 }
 0x1f2   : > { %v3296_v39 = vpop.f32.mrf.mxu1  ;;  %1514 = vmatprep.mubr.bf16.mxu0 %v3671_v2 }
 0x1f3   : > { %v1191_v40 = vadd.f32 %v3295_v38, %v4045_v8 }
 0x1f4   : > { %v3297_v41 = vpop.f32.mrf.mxu1 }
 0x1f5   : > { %v1279_v43 = vmax.f32 %v1191_v40, 0.0  ;;  %v3298_v44 = vadd.f32 %v3297_v41, %v3296_v39 }
 0x1f6   : > { %v3299_v45 = vpop.f32.mrf.mxu1 }
 0x1f7   : > { %v1304_v46 = vpack.c.bf16 %v1279_v43, %v1278_v42  ;;  %v1196_v48 = vadd.f32 %v3298_v44, %v4045_v8 }
 0x1f8   : > { %v3300_v47 = vpop.f32.mrf.mxu1 }
 0x1f9   : > { %v3301_v49 = vadd.f32 %v3300_v47, %v3299_v45  ;;  %1515 = vmatmul.mubr.bf16.gmra.mxu0 %v1304_v46  ;;  %v1280_v53 = vmax.f32 %v1196_v48, 0.0 }
 0x1fa   : > { %v3302_v50 = vpop.f32.mrf.mxu1  ;;  %1524 = vmatprep.mubr.bf16.mxu0 %v3671_v2 }
 0x1fb   : > { %v1199_v51 = vadd.f32 %v3301_v49, %v4045_v8 }
 0x1fc   : > { %v3303_v52 = vpop.f32.mrf.mxu1 }
 0x1fd   : > { %v1281_v54 = vmax.f32 %v1199_v51, 0.0  ;;  %v3304_v57 = vadd.f32 %v3303_v52, %v3302_v50 }
 0x1fe   : > { %v3305_v58 = vpop.f32.mrf.mxu1 }
 0x1ff   : > { %v1305_v62 = vpack.c.bf16 %v1281_v54, %v1280_v53  ;;  %v1204_v60 = vadd.f32 %v3304_v57, %v4045_v8 }
 0x200   : > { %v3306_v59 = vpop.f32.mrf.mxu1 }
 0x201   : > { %v3307_v61 = vadd.f32 %v3306_v59, %v3305_v58  ;;  %1525 = vmatmul.mubr.bf16.gmra.mxu0 %v1305_v62  ;;  %v1282_v3 = vmax.f32 %v1204_v60, 0.0 }
 0x202   : > { %v3308_v63 = vpop.f32.mrf.mxu1  ;;  %1534 = vmatprep.mubr.bf16.mxu0 %v3671_v2 }
 0x203   : > { %v1207_v0 = vadd.f32 %v3307_v61, %v4045_v8 }
 0x204   : > { %v3309_v1 = vpop.f32.mrf.mxu1 }
 0x205   : > { %v1283_v4 = vmax.f32 %v1207_v0, 0.0  ;;  %v3310_v5 = vadd.f32 %v3309_v1, %v3308_v63 }
 0x206   : > { %v3311_v6 = vpop.f32.mrf.mxu1 }
 0x207   : > { %v1306_v7 = vpack.c.bf16 %v1283_v4, %v1282_v3  ;;  %v1212_v10 = vadd.f32 %v3310_v5, %v4045_v8 }
 0x208   : > { %v3312_v9 = vpop.f32.mrf.mxu1 }
 0x209   : > { %v3313_v11 = vadd.f32 %v3312_v9, %v3311_v6  ;;  %1535 = vmatmul.mubr.bf16.gmra.mxu0 %v1306_v7  ;;  %v1284_v15 = vmax.f32 %v1212_v10, 0.0 }
 0x20a   : > { %v3314_v12 = vpop.f32.mrf.mxu1  ;;  %1544 = vmatprep.mubr.bf16.mxu0 %v3671_v2 }
 0x20b   : > { %v1215_v13 = vadd.f32 %v3313_v11, %v4045_v8 }
 0x20c   : > { %v3315_v14 = vpop.f32.mrf.mxu1 }
 0x20d   : > { %v1285_v16 = vmax.f32 %v1215_v13, 0.0  ;;  %v3316_v17 = vadd.f32 %v3315_v14, %v3314_v12 }
 0x20e   : > { %v3317_v18 = vpop.f32.mrf.mxu1 }
 0x20f   : > { %v1307_v19 = vpack.c.bf16 %v1285_v16, %v1284_v15  ;;  %v1220_v21 = vadd.f32 %v3316_v17, %v4045_v8 }
 0x210   : > { %v3318_v20 = vpop.f32.mrf.mxu1 }
 0x211   : > { %v3319_v22 = vadd.f32 %v3318_v20, %v3317_v18  ;;  %1545 = vmatmul.mubr.bf16.gmra.mxu0 %v1307_v19  ;;  %v1286_v28 = vmax.f32 %v1220_v21, 0.0 }
 0x212   : > { %v3320_v24 = vpop.f32.mrf.mxu1  ;;  %1554 = vmatprep.mubr.bf16.mxu0 %v3671_v2 }
 0x213   : > { %v1223_v26 = vadd.f32 %v3319_v22, %v4045_v8 }
 0x214   : > { %v3321_v27 = vpop.f32.mrf.mxu1 }
 0x215   : > { %v1287_v29 = vmax.f32 %v1223_v26, 0.0  ;;  %v3322_v30 = vadd.f32 %v3321_v27, %v3320_v24  ;;  %v3599_v24 = vld [vmem:[%s4610_s9 + $0x70] ss:$8 sps:$4 sm:$0xff]   ;;  %v3607_v27 = vld [vmem:[%s4610_s9 + $0x54] ss:$8 sps:$4 sm:$0xff]  }
 0x216   : > { %v3323_v31 = vpop.f32.mrf.mxu1  ;;  %2409 = vmatpush1.bf16.msra.mxu0 %v3599_v24  ;;  %v3605_v26 = vld [vmem:[%s4610_s9 + $0x50] ss:$8 sps:$4 sm:$0xff]  }
 0x217   : > { %v1308_v32 = vpack.c.bf16 %v1287_v29, %v1286_v28  ;;  %v1228_v34 = vadd.f32 %v3322_v30, %v4045_v8  ;;  %v3608_v28 = vld [vmem:[%s4610_s9 + $0x40] ss:$8 sps:$4 sm:$0xff]   ;;  %v3610_v29 = vld [vmem:[%s4610_s9 + $0x44] ss:$8 sps:$4 sm:$0xff]   ;;  %v3611_v30 = vld [vmem:[%s4610_s9 + $0x30] ss:$8 sps:$4 sm:$0xff]  }
 0x218   : > { %v3324_v33 = vpop.f32.mrf.mxu1 }
 0x219   : > { %v3325_v35 = vadd.f32 %v3324_v33, %v3323_v31  ;;  %1555 = vmatmul.mubr.bf16.gmra.mxu0 %v1308_v32  ;;  %v1288_v39 = vmax.f32 %v1228_v34, 0.0  ;;  %v3613_v31 = vld [vmem:[%s4610_s9 + $0x34] ss:$8 sps:$4 sm:$0xff]   ;;  %v1330_v32 = vld [vmem:[%s4607_s6] sm:$0x3] }
 0x21a   : > { %v3326_v36 = vpop.f32.mrf.mxu1  ;;  %1564 = vmatprep.mubr.bf16.mxu0 %v3671_v2  ;;  %v4194_v34 = vrot.slane %v1330_v32, %v3899_v55 }
 0x21b   : > { %v1231_v37 = vadd.f32 %v3325_v35, %v4045_v8  ;;  %v4197_v35 = vrot.slane %v1330_v32, %v3901_v56 }
 0x21c   : > { %v3327_v38 = vpop.f32.mrf.mxu1 }
 0x21d   : > { %v1289_v40 = vmax.f32 %v1231_v37, 0.0  ;;  %v3328_v41 = vadd.f32 %v3327_v38, %v3326_v36  ;;  %v3614_v37 = vld [vmem:[%s4610_s9 + $0x20] ss:$8 sps:$4 sm:$0xff]   ;;  %v3616_v38 = vld [vmem:[%s4610_s9 + $0x24] ss:$8 sps:$4 sm:$0xff]  }
 0x21e   : > { %v3329_v42 = vpop.f32.mrf.mxu1 }
 0x21f   : > { %v1309_v43 = vpack.c.bf16 %v1289_v40, %v1288_v39  ;;  %v1236_v45 = vadd.f32 %v3328_v41, %v4045_v8 }
 0x220   : > { %v3330_v44 = vpop.f32.mrf.mxu1 }
 0x221   : > { %v3331_v46 = vadd.f32 %v3330_v44, %v3329_v42  ;;  %1565 = vmatmul.mubr.bf16.gmra.mxu0 %v1309_v43  ;;  %v1290_v50 = vmax.f32 %v1236_v45, 0.0  ;;  %v3617_v44 = vld [vmem:[%s4610_s9 + $0x10] ss:$8 sps:$4 sm:$0xff]   ;;  %v3619_v45 = vld [vmem:[%s4610_s9 + $0x14] ss:$8 sps:$4 sm:$0xff]  }
 0x222   : > { %v3332_v47 = vpop.f32.mrf.mxu1  ;;  %1574 = vmatprep.mubr.bf16.mxu0 %v3671_v2 }
 0x223   : > { %v1239_v48 = vadd.f32 %v3331_v46, %v4045_v8 }
 0x224   : > { %v3333_v49 = vpop.f32.mrf.mxu1 }
 0x225   : > { %v1291_v51 = vmax.f32 %v1239_v48, 0.0  ;;  %v3334_v52 = vadd.f32 %v3333_v49, %v3332_v47  ;;  %v3622_v47 = vld [vmem:[%s4610_s9 + $0x4] ss:$8 sps:$4 sm:$0xff]  }
 0x226   : > { %v3335_v53 = vpop.f32.mrf.mxu1 }
 0x227   : > { %v1310_v54 = vpack.c.bf16 %v1291_v51, %v1290_v50  ;;  %v1244_v58 = vadd.f32 %v3334_v52, %v4045_v8 }
 0x228   : > { %v3336_v57 = vpop.f32.mrf.mxu1 }
 0x229   : > { %v3337_v62 = vadd.f32 %v3336_v57, %v3335_v53  ;;  %1575 = vmatmul.mubr.bf16.gmra.mxu0 %v1310_v54  ;;  %v1292_v63 = vmax.f32 %v1244_v58, 0.0  ;;  %v3620_v54 = vld [vmem:[%s4610_s9] ss:$8 sps:$4 sm:$0xff]   ;;  %v3625_v58 = vld [vmem:[%s4610_s9 + $0xf4] ss:$8 sps:$4 sm:$0xff]  }
 0x22a   : > { %v3338_v59 = vpop.f32.mrf.mxu1  ;;  %1584 = vmatprep.mubr.bf16.mxu0 %v3671_v2 }
 0x22b   : > { %v1247_v60 = vadd.f32 %v3337_v62, %v4045_v8 }
 0x22c   : > { %v3339_v61 = vpop.f32.mrf.mxu1 }
 0x22d   : > { %v1293_v0 = vmax.f32 %v1247_v60, 0.0  ;;  %v3340_v1 = vadd.f32 %v3339_v61, %v3338_v59 }
 0x22e   : > { %v3341_v3 = vpop.f32.mrf.mxu1 }
 0x22f   : > { %v1311_v4 = vpack.c.bf16 %v1293_v0, %v1292_v63  ;;  %v1252_v6 = vadd.f32 %v3340_v1, %v4045_v8  ;;  %v3623_v1 = vld [vmem:[%s4610_s9 + $0xf0] ss:$8 sps:$4 sm:$0xff]  }
 0x230   : > { %v3342_v5 = vpop.f32.mrf.mxu1 }
 0x231   : > { %v3343_v7 = vadd.f32 %v3342_v5, %v3341_v3  ;;  %1585 = vmatmul.mubr.bf16.gmra.mxu0 %v1311_v4  ;;  %v1294_v12 = vmax.f32 %v1252_v6, 0.0  ;;  %v3628_v4 = vld [vmem:[%s4610_s9 + $0xe4] ss:$8 sps:$4 sm:$0xff]  }
 0x232   : > { %v3344_v9 = vpop.f32.mrf.mxu1  ;;  %1594 = vmatprep.mubr.bf16.mxu0 %v3671_v2 }
 0x233   : > { %v1255_v10 = vadd.f32 %v3343_v7, %v4045_v8 }
 0x234   : > { %v3345_v11 = vpop.f32.mrf.mxu1 }
 0x235   : > { %v1295_v13 = vmax.f32 %v1255_v10, 0.0  ;;  %v3346_v14 = vadd.f32 %v3345_v11, %v3344_v9 }
 0x236   : > { %v3347_v15 = vpop.f32.mrf.mxu1 }
 0x237   : > { %v1312_v16 = vpack.c.bf16 %v1295_v13, %v1294_v12  ;;  %v1260_v18 = vadd.f32 %v3346_v14, %v4045_v8  ;;  %v3626_v12 = vld [vmem:[%s4610_s9 + $0xe0] ss:$8 sps:$4 sm:$0xff]   ;;  %v3631_v14 = vld [vmem:[%s4610_s9 + $0xd4] ss:$8 sps:$4 sm:$0xff]  }
 0x238   : > { %v3348_v17 = vpop.f32.mrf.mxu1 }
 0x239   : > { %v3349_v19 = vadd.f32 %v3348_v17, %v3347_v15  ;;  %1595 = vmatmul.mubr.bf16.gmra.mxu0 %v1312_v16  ;;  %v1296_v21 = vmax.f32 %v1260_v18, 0.0 }
 0x23a   : > { %1604 = vmatprep.mubr.bf16.mxu0 %v3671_v2  ;;  %v3602_v2 = vld [vmem:[%s4610_s9 + $0x60] ss:$8 sps:$4 sm:$0xff]  }
 0x23b   : > { %v1263_v20 = vadd.f32 %v3349_v19, %v4045_v8  ;;  %v3604_v8 = vld [vmem:[%s4610_s9 + $0x64] ss:$8 sps:$4 sm:$0xff]  }
 0x23c   : > { %2410 = vmatprep.subr.bf16.mxu0 %v3604_v8 }
 0x23d   : > { %v1297_v22 = vmax.f32 %v1263_v20, 0.0  ;;  %2411 = vmatpush1.bf16.msra.mxu0 %v3602_v2 }
 0x23e   : > { %2412 = vmatprep.subr.bf16.mxu0 %v3607_v27 }
 0x23f   : > { %v1313_v23 = vpack.c.bf16 %v1297_v22, %v1296_v21  ;;  %v3629_v21 = vld [vmem:[%s4610_s9 + $0xd0] ss:$8 sps:$4 sm:$0xff]  }
 0x241   : > { %1605 = vmatmul.mubr.bf16.gmra.mxu0 %v1313_v23  ;;  %v3634_v23 = vld [vmem:[%s4610_s9 + $0xc4] ss:$8 sps:$4 sm:$0xff]  }
 0x242   : > { %2413 = vmatpush1.bf16.msra.mxu0 %v3605_v26 }
 0x243   : > { %2414 = vmatprep.subr.bf16.mxu0 %v3610_v29 }
 0x246   : > { %2415 = vmatpush1.bf16.msra.mxu0 %v3608_v28  ;;  %v3632_v28 = vld [vmem:[%s4610_s9 + $0xc0] ss:$8 sps:$4 sm:$0xff]  }
 0x247   : > { %2416 = vmatprep.subr.bf16.mxu0 %v3613_v31 }
 0x24a   : > { %2417 = vmatpush1.bf16.msra.mxu0 %v3611_v30  ;;  %v3637_v30 = vld [vmem:[%s4610_s9 + $0xb4] ss:$8 sps:$4 sm:$0xff]  }
 0x24b   : > { %2418 = vmatprep.subr.bf16.mxu0 %v3616_v38 }
 0x24e   : > { %2419 = vmatpush1.bf16.msra.mxu0 %v3614_v37 }
 0x24f   : > { %2420 = vmatprep.subr.bf16.mxu0 %v3619_v45 }
 0x252   : > { %2421 = vmatpush1.bf16.msra.mxu0 %v3617_v44 }
 0x253   : > { %2422 = vmatprep.subr.bf16.mxu0 %v3622_v47 }
 0x256   : > { %2423 = vmatpush1.bf16.msra.mxu0 %v3620_v54 }
 0x257   : > { %2424 = vmatprep.subr.bf16.mxu0 %v3625_v58 }
 0x25a   : > { %2425 = vmatpush2.bf16.msra.mxu0 %v3623_v1 }
 0x25b   : > { %2426 = vmatprep.subr.bf16.mxu0 %v3628_v4 }
 0x25e   : > { %2427 = vmatpush2.bf16.msra.mxu0 %v3626_v12 }
 0x25f   : > { %2428 = vmatprep.subr.bf16.mxu0 %v3631_v14 }
 0x262   : > { %2429 = vmatpush2.bf16.msra.mxu0 %v3629_v21 }
 0x263   : > { %2430 = vmatprep.subr.bf16.mxu0 %v3634_v23 }
 0x266   : > { %2431 = vmatpush2.bf16.msra.mxu0 %v3632_v28 }
 0x267   : > { %2432 = vmatprep.subr.bf16.mxu0 %v3637_v30 }
 0x289   : > { %v1456_v33 = vpop.f32.mrf.mxu0 }
 0x28a   : > { %v1457_v42 = vadd.f32 %v1456_v33, %v4197_v35 }
 0x28b   : > { %v1458_v36 = vpop.f32.mrf.mxu0 }
 0x28c   : > { %v1459_v40 = vadd.f32 %v1458_v36, %v4194_v34  ;;  %v1615_v52 = vmax.f32 %v1457_v42, 0.0 }
 0x28d   : > { %v1460_v39 = vpop.f32.mrf.mxu0 }
 0x28e   : > { %v1461_v41 = vadd.f32 %v1460_v39, %v4197_v35  ;;  %v1616_v50 = vmax.f32 %v1459_v40, 0.0  ;;  %v3635_v39 = vld [vmem:[%s4610_s9 + $0xb0] ss:$8 sps:$4 sm:$0xff]  }
 0x28f   : > { %v1462_v43 = vpop.f32.mrf.mxu0  ;;  %2433 = vmatpush2.bf16.msra.mxu0 %v3635_v39 }
 0x290   : > { %v1463_v46 = vadd.f32 %v1462_v43, %v4194_v34  ;;  %v1617_v48 = vmax.f32 %v1461_v41, 0.0  ;;  %v3640_v41 = vld [vmem:[%s4610_s9 + $0xa4] ss:$8 sps:$4 sm:$0xff]  }
 0x291   : > { %v1466_v49 = vpop.f32.mrf.mxu0  ;;  %2434 = vmatprep.subr.bf16.mxu0 %v3640_v41 }
 0x292   : > { %v1618_v51 = vmax.f32 %v1463_v46, 0.0  ;;  %v1679_v62 = vpack.c.bf16 %v1617_v48, %v1615_v52  ;;  %v1467_v63 = vadd.f32 %v1466_v49, %v4197_v35  ;;  %v3638_v48 = vld [vmem:[%s4610_s9 + $0xa0] ss:$8 sps:$4 sm:$0xff]  }
 0x293   : > { %v1468_v53 = vpop.f32.mrf.mxu0  ;;  %2435 = vmatpush2.bf16.msra.mxu0 %v3638_v48 }
 0x294   : > { %v1680_v57 = vpack.c.bf16 %v1618_v51, %v1616_v50  ;;  %v1469_v60 = vadd.f32 %v1468_v53, %v4194_v34  ;;  %v1619_v10 = vmax.f32 %v1467_v63, 0.0  ;;  %v3643_v50 = vld [vmem:[%s4610_s9 + $0x94] ss:$8 sps:$4 sm:$0xff]  }
 0x295   : > { %v1470_v59 = vpop.f32.mrf.mxu0  ;;  %2436 = vmatprep.subr.bf16.mxu0 %v3643_v50 }
 0x296   : > { %v1471_v61 = vadd.f32 %v1470_v59, %v4197_v35  ;;  %1947 = vmatprep.mubr.bf16.mxu1 %v1680_v57  ;;  %v1620_v7 = vmax.f32 %v1469_v60, 0.0 }
 0x297   : > { %v1472_v0 = vpop.f32.mrf.mxu0  ;;  %1948 = vmatmul.mubr.bf16.vlgmr.msra.gmra.mxu1 %v1679_v62  ;;  %v3641_v62 = vld [vmem:[%s4610_s9 + $0x90] ss:$8 sps:$4 sm:$0xff]  }
 0x298   : > { %v1473_v3 = vadd.f32 %v1472_v0, %v4194_v34  ;;  %v1621_v5 = vmax.f32 %v1471_v61, 0.0  ;;  %2437 = vmatpush2.bf16.msra.mxu0 %v3641_v62 }
 0x299   : > { %v1476_v6 = vpop.f32.mrf.mxu0 }
 0x29a   : > { %v1622_v9 = vmax.f32 %v1473_v3, 0.0  ;;  %v1681_v15 = vpack.c.bf16 %v1621_v5, %v1619_v10  ;;  %v1477_v19 = vadd.f32 %v1476_v6, %v4197_v35 }
 0x29b   : > { %v1478_v11 = vpop.f32.mrf.mxu0 }
 0x29c   : > { %v1682_v13 = vpack.c.bf16 %v1622_v9, %v1620_v7  ;;  %v1479_v17 = vadd.f32 %v1478_v11, %v4194_v34  ;;  %v1623_v26 = vmax.f32 %v1477_v19, 0.0 }
 0x29d   : > { %v1480_v16 = vpop.f32.mrf.mxu0 }
 0x29e   : > { %v1481_v18 = vadd.f32 %v1480_v16, %v4197_v35  ;;  %1957 = vmatprep.mubr.bf16.mxu1 %v1682_v13  ;;  %v1624_v2 = vmax.f32 %v1479_v17, 0.0 }
 0x29f   : > { %v1482_v20 = vpop.f32.mrf.mxu0  ;;  %1958 = vmatmul.mubr.bf16.gmra.mxu1 %v1681_v15 }
 0x2a0   : > { %v1483_v22 = vadd.f32 %v1482_v20, %v4194_v34  ;;  %v1625_v24 = vmax.f32 %v1481_v18, 0.0 }
 0x2a1   : > { %v1486_v25 = vpop.f32.mrf.mxu0 }
 0x2a2   : > { %v1626_v8 = vmax.f32 %v1483_v22, 0.0  ;;  %v1683_v31 = vpack.c.bf16 %v1625_v24, %v1623_v26  ;;  %v1487_v37 = vadd.f32 %v1486_v25, %v4197_v35 }
 0x2a3   : > { %v1488_v27 = vpop.f32.mrf.mxu0 }
 0x2a4   : > { %v1684_v29 = vpack.c.bf16 %v1626_v8, %v1624_v2  ;;  %v1489_v33 = vadd.f32 %v1488_v27, %v4194_v34  ;;  %v1627_v46 = vmax.f32 %v1487_v37, 0.0 }
 0x2a5   : > { %v1490_v32 = vpop.f32.mrf.mxu0 }
 0x2a6   : > { %v1491_v36 = vadd.f32 %v1490_v32, %v4197_v35  ;;  %1967 = vmatprep.mubr.bf16.mxu1 %v1684_v29  ;;  %v1628_v44 = vmax.f32 %v1489_v33, 0.0 }
 0x2a7   : > { %v1492_v38 = vpop.f32.mrf.mxu0  ;;  %1968 = vmatmul.mubr.bf16.gmra.mxu1 %v1683_v31 }
 0x2a8   : > { %v1493_v40 = vadd.f32 %v1492_v38, %v4194_v34  ;;  %v1629_v42 = vmax.f32 %v1491_v36, 0.0 }
 0x2a9   : > { %v1496_v43 = vpop.f32.mrf.mxu0 }
 0x2aa   : > { %v1630_v45 = vmax.f32 %v1493_v40, 0.0  ;;  %v1685_v51 = vpack.c.bf16 %v1629_v42, %v1627_v46  ;;  %v1497_v57 = vadd.f32 %v1496_v43, %v4197_v35 }
 0x2ab   : > { %v1498_v47 = vpop.f32.mrf.mxu0 }
 0x2ac   : > { %v1686_v49 = vpack.c.bf16 %v1630_v45, %v1628_v44  ;;  %v1499_v53 = vadd.f32 %v1498_v47, %v4194_v34  ;;  %v1631_v1 = vmax.f32 %v1497_v57, 0.0 }
 0x2ad   : > { %v1500_v52 = vpop.f32.mrf.mxu0 }
 0x2ae   : > { %v1501_v54 = vadd.f32 %v1500_v52, %v4197_v35  ;;  %1977 = vmatprep.mubr.bf16.mxu1 %v1686_v49  ;;  %v1632_v63 = vmax.f32 %v1499_v53, 0.0 }
 0x2af   : > { %v1502_v58 = vpop.f32.mrf.mxu0  ;;  %1978 = vmatmul.mubr.bf16.gmra.mxu1 %v1685_v51 }
 0x2b0   : > { %v1503_v59 = vadd.f32 %v1502_v58, %v4194_v34  ;;  %v1633_v60 = vmax.f32 %v1501_v54, 0.0 }
 0x2b1   : > { %v1506_v61 = vpop.f32.mrf.mxu0 }
 0x2b2   : > { %v1634_v0 = vmax.f32 %v1503_v59, 0.0  ;;  %v1687_v5 = vpack.c.bf16 %v1633_v60, %v1631_v1  ;;  %v1507_v10 = vadd.f32 %v1506_v61, %v4197_v35 }
 0x2b3   : > { %v1508_v3 = vpop.f32.mrf.mxu0 }
 0x2b4   : > { %v1688_v4 = vpack.c.bf16 %v1634_v0, %v1632_v63  ;;  %v1509_v7 = vadd.f32 %v1508_v3, %v4194_v34  ;;  %v1635_v17 = vmax.f32 %v1507_v10, 0.0 }
 0x2b5   : > { %v1510_v6 = vpop.f32.mrf.mxu0 }
 0x2b6   : > { %v1511_v9 = vadd.f32 %v1510_v6, %v4197_v35  ;;  %1987 = vmatprep.mubr.bf16.mxu1 %v1688_v4  ;;  %v1636_v15 = vmax.f32 %v1509_v7, 0.0 }
 0x2b7   : > { %v1512_v11 = vpop.f32.mrf.mxu0  ;;  %1988 = vmatmul.mubr.bf16.gmra.mxu1 %v1687_v5 }
 0x2b8   : > { %v1513_v12 = vadd.f32 %v1512_v11, %v4194_v34  ;;  %v1637_v13 = vmax.f32 %v1511_v9, 0.0 }
 0x2b9   : > { %v1516_v14 = vpop.f32.mrf.mxu0 }
 0x2ba   : > { %v1638_v16 = vmax.f32 %v1513_v12, 0.0  ;;  %v1689_v20 = vpack.c.bf16 %v1637_v13, %v1635_v17  ;;  %v1517_v24 = vadd.f32 %v1516_v14, %v4197_v35 }
 0x2bb   : > { %v1518_v18 = vpop.f32.mrf.mxu0 }
 0x2bc   : > { %v1690_v19 = vpack.c.bf16 %v1638_v16, %v1636_v15  ;;  %v1519_v22 = vadd.f32 %v1518_v18, %v4194_v34  ;;  %v1639_v29 = vmax.f32 %v1517_v24, 0.0  ;;  %v3644_v24 = vld [vmem:[%s4610_s9 + $0x80] ss:$8 sps:$4 sm:$0xff]  }
 0x2bd   : > { %v1520_v21 = vpop.f32.mrf.mxu0 }
 0x2be   : > { %v1521_v23 = vadd.f32 %v1520_v21, %v4197_v35  ;;  %1997 = vmatprep.mubr.bf16.mxu1 %v1690_v19  ;;  %v1640_v27 = vmax.f32 %v1519_v22, 0.0  ;;  %v3646_v22 = vld [vmem:[%s4610_s9 + $0x84] ss:$8 sps:$4 sm:$0xff]  }
 0x2bf   : > { %v1522_v25 = vpop.f32.mrf.mxu0  ;;  %1998 = vmatmul.mubr.bf16.gmra.mxu1 %v1689_v20  ;;  %2438 = vmatprep.subr.bf16.mxu0 %v3646_v22 }
 0x2c0   : > { %v1523_v2 = vadd.f32 %v1522_v25, %v4194_v34  ;;  %v1641_v8 = vmax.f32 %v1521_v23, 0.0  ;;  %2439 = vmatpush2.bf16.msra.mxu0 %v3644_v24 }
 0x2c1   : > { %v1526_v26 = vpop.f32.mrf.mxu0 }
 0x2c2   : > { %v1642_v28 = vmax.f32 %v1523_v2, 0.0  ;;  %v1691_v32 = vpack.c.bf16 %v1641_v8, %v1639_v29  ;;  %v1527_v38 = vadd.f32 %v1526_v26, %v4197_v35 }
 0x2c3   : > { %v1528_v30 = vpop.f32.mrf.mxu0 }
 0x2c4   : > { %v1692_v31 = vpack.c.bf16 %v1642_v28, %v1640_v27  ;;  %v1529_v36 = vadd.f32 %v1528_v30, %v4194_v34  ;;  %v1643_v45 = vmax.f32 %v1527_v38, 0.0 }
 0x2c5   : > { %v1530_v33 = vpop.f32.mrf.mxu0 }
 0x2c6   : > { %v1531_v37 = vadd.f32 %v1530_v33, %v4197_v35  ;;  %2007 = vmatprep.mubr.bf16.mxu1 %v1692_v31  ;;  %v1644_v43 = vmax.f32 %v1529_v36, 0.0 }
 0x2c7   : > { %v1532_v39 = vpop.f32.mrf.mxu0  ;;  %2008 = vmatmul.mubr.bf16.gmra.mxu1 %v1691_v32 }
 0x2c8   : > { %v1533_v40 = vadd.f32 %v1532_v39, %v4194_v34  ;;  %v1645_v41 = vmax.f32 %v1531_v37, 0.0 }
 0x2c9   : > { %v1536_v42 = vpop.f32.mrf.mxu0 }
 0x2ca   : > { %v1646_v44 = vmax.f32 %v1533_v40, 0.0  ;;  %v1693_v48 = vpack.c.bf16 %v1645_v41, %v1643_v45  ;;  %v1537_v52 = vadd.f32 %v1536_v42, %v4197_v35 }
 0x2cb   : > { %v1538_v46 = vpop.f32.mrf.mxu0 }
 0x2cc   : > { %v1694_v47 = vpack.c.bf16 %v1646_v44, %v1644_v43  ;;  %v1539_v50 = vadd.f32 %v1538_v46, %v4194_v34  ;;  %v1647_v60 = vmax.f32 %v1537_v52, 0.0 }
 0x2cd   : > { %v1540_v49 = vpop.f32.mrf.mxu0 }
 0x2ce   : > { %v1541_v51 = vadd.f32 %v1540_v49, %v4197_v35  ;;  %2017 = vmatprep.mubr.bf16.mxu1 %v1694_v47  ;;  %v1648_v62 = vmax.f32 %v1539_v50, 0.0 }
 0x2cf   : > { %v1542_v53 = vpop.f32.mrf.mxu0  ;;  %2018 = vmatmul.mubr.bf16.gmra.mxu1 %v1693_v48 }
 0x2d0   : > { %v1543_v54 = vadd.f32 %v1542_v53, %v4194_v34  ;;  %v1649_v57 = vmax.f32 %v1541_v51, 0.0 }
 0x2d1   : > { %v1546_v58 = vpop.f32.mrf.mxu0 }
 0x2d2   : > { %v1650_v59 = vmax.f32 %v1543_v54, 0.0  ;;  %v1695_v0 = vpack.c.bf16 %v1649_v57, %v1647_v60  ;;  %v1547_v5 = vadd.f32 %v1546_v58, %v4197_v35 }
 0x2d3   : > { %v1548_v61 = vpop.f32.mrf.mxu0 }
 0x2d4   : > { %v1696_v63 = vpack.c.bf16 %v1650_v59, %v1648_v62  ;;  %v1549_v3 = vadd.f32 %v1548_v61, %v4194_v34  ;;  %v1651_v13 = vmax.f32 %v1547_v5, 0.0 }
 0x2d5   : > { %v1550_v1 = vpop.f32.mrf.mxu0 }
 0x2d6   : > { %v1551_v4 = vadd.f32 %v1550_v1, %v4197_v35  ;;  %2027 = vmatprep.mubr.bf16.mxu1 %v1696_v63  ;;  %v1652_v11 = vmax.f32 %v1549_v3, 0.0 }
 0x2d7   : > { %v1552_v6 = vpop.f32.mrf.mxu0  ;;  %2028 = vmatmul.mubr.bf16.gmra.mxu1 %v1695_v0 }
 0x2d8   : > { %v1553_v7 = vadd.f32 %v1552_v6, %v4194_v34  ;;  %v1653_v9 = vmax.f32 %v1551_v4, 0.0 }
 0x2d9   : > { %v1556_v10 = vpop.f32.mrf.mxu0 }
 0x2da   : > { %v1654_v12 = vmax.f32 %v1553_v7, 0.0  ;;  %v1697_v16 = vpack.c.bf16 %v1653_v9, %v1651_v13  ;;  %v1557_v20 = vadd.f32 %v1556_v10, %v4197_v35 }
 0x2db   : > { %v1558_v14 = vpop.f32.mrf.mxu0 }
 0x2dc   : > { %v1698_v15 = vpack.c.bf16 %v1654_v12, %v1652_v11  ;;  %v1559_v18 = vadd.f32 %v1558_v14, %v4194_v34  ;;  %v1655_v27 = vmax.f32 %v1557_v20, 0.0 }
 0x2dd   : > { %v1560_v17 = vpop.f32.mrf.mxu0 }
 0x2de   : > { %v1561_v19 = vadd.f32 %v1560_v17, %v4197_v35  ;;  %2037 = vmatprep.mubr.bf16.mxu1 %v1698_v15  ;;  %v1656_v8 = vmax.f32 %v1559_v18, 0.0 }
 0x2df   : > { %v1562_v21 = vpop.f32.mrf.mxu0  ;;  %2038 = vmatmul.mubr.bf16.gmra.mxu1 %v1697_v16 }
 0x2e0   : > { %v1563_v23 = vadd.f32 %v1562_v21, %v4194_v34  ;;  %v1657_v25 = vmax.f32 %v1561_v19, 0.0 }
 0x2e1   : > { %v1566_v2 = vpop.f32.mrf.mxu0 }
 0x2e2   : > { %v1658_v26 = vmax.f32 %v1563_v23, 0.0  ;;  %v1699_v30 = vpack.c.bf16 %v1657_v25, %v1655_v27  ;;  %v1567_v36 = vadd.f32 %v1566_v2, %v4197_v35 }
 0x2e3   : > { %v1568_v28 = vpop.f32.mrf.mxu0 }
 0x2e4   : > { %v1700_v29 = vpack.c.bf16 %v1658_v26, %v1656_v8  ;;  %v1569_v32 = vadd.f32 %v1568_v28, %v4194_v34  ;;  %v1659_v43 = vmax.f32 %v1567_v36, 0.0 }
 0x2e5   : > { %v1570_v31 = vpop.f32.mrf.mxu0 }
 0x2e6   : > { %v1571_v33 = vadd.f32 %v1570_v31, %v4197_v35  ;;  %2047 = vmatprep.mubr.bf16.mxu1 %v1700_v29  ;;  %v1660_v41 = vmax.f32 %v1569_v32, 0.0 }
 0x2e7   : > { %v1572_v37 = vpop.f32.mrf.mxu0  ;;  %2048 = vmatmul.mubr.bf16.gmra.mxu1 %v1699_v30 }
 0x2e8   : > { %v1573_v38 = vadd.f32 %v1572_v37, %v4194_v34  ;;  %v1661_v39 = vmax.f32 %v1571_v33, 0.0 }
 0x2e9   : > { %v1576_v40 = vpop.f32.mrf.mxu0 }
 0x2ea   : > { %v1662_v42 = vmax.f32 %v1573_v38, 0.0  ;;  %v1701_v46 = vpack.c.bf16 %v1661_v39, %v1659_v43  ;;  %v1577_v50 = vadd.f32 %v1576_v40, %v4197_v35  ;;  %v3651_v43 = vld [vmem:[%s4612_s11 + $0x68] sm:$0xff]  }
 0x2eb   : > { %v1578_v44 = vpop.f32.mrf.mxu0 }
 0x2ec   : > { %v1702_v45 = vpack.c.bf16 %v1662_v42, %v1660_v41  ;;  %v1579_v48 = vadd.f32 %v1578_v44, %v4194_v34  ;;  %v1663_v62 = vmax.f32 %v1577_v50, 0.0  ;;  %v3647_v41 = vld [vmem:[%s4612_s11 + $0x78] sm:$0xff]   ;;  %v3650_v42 = vld [vmem:[%s4612_s11 + $0x30] sm:$0xff]   ;;  %v1743_v44 = vld [vmem:[%s4609_s8] sm:$0x3] }
 0x2ed   : > { %v1580_v47 = vpop.f32.mrf.mxu0  ;;  %3350 = vmatprep.subr.bf16.mxu1 %v3647_v41 }
 0x2ee   : > { %v1581_v49 = vadd.f32 %v1580_v47, %v4197_v35  ;;  %2057 = vmatprep.mubr.bf16.mxu1 %v1702_v45  ;;  %v1664_v57 = vmax.f32 %v1579_v48, 0.0  ;;  %v3652_v47 = vld [vmem:[%s4612_s11 + $0x28] sm:$0xff]   ;;  %v4354_v48 = vrot.slane %v1743_v44, %v3901_v56 }
 0x2ef   : > { %v1582_v51 = vpop.f32.mrf.mxu0  ;;  %2058 = vmatmul.mubr.bf16.gmra.mxu1 %v1701_v46  ;;  %v4348_v46 = vrot.slane %v1743_v44, %v3899_v55 }
 0x2f0   : > { %v1583_v52 = vadd.f32 %v1582_v51, %v4194_v34  ;;  %v1665_v53 = vmax.f32 %v1581_v49, 0.0 }
 0x2f1   : > { %v1586_v54 = vpop.f32.mrf.mxu0 }
 0x2f2   : > { %v1666_v58 = vmax.f32 %v1583_v52, 0.0  ;;  %v1703_v61 = vpack.c.bf16 %v1665_v53, %v1663_v62  ;;  %v1587_v3 = vadd.f32 %v1586_v54, %v4197_v35  ;;  %v3655_v62 = vld [vmem:[%s4612_s11 + $0x58] sm:$0xff]  }
 0x2f3   : > { %v1588_v59 = vpop.f32.mrf.mxu0 }
 0x2f4   : > { %v1704_v60 = vpack.c.bf16 %v1666_v58, %v1664_v57  ;;  %v1589_v0 = vadd.f32 %v1588_v59, %v4194_v34  ;;  %v1667_v11 = vmax.f32 %v1587_v3, 0.0  ;;  %v3653_v57 = vld [vmem:[%s4612_s11 + $0x60] sm:$0xff]  }
 0x2f5   : > { %v1590_v63 = vpop.f32.mrf.mxu0  ;;  %v3654_v58 = vld [vmem:[%s4612_s11 + $0x20] sm:$0xff]  }
 0x2f6   : > { %v1591_v1 = vadd.f32 %v1590_v63, %v4197_v35  ;;  %2067 = vmatprep.mubr.bf16.mxu1 %v1704_v60  ;;  %v1668_v9 = vmax.f32 %v1589_v0, 0.0 }
 0x2f7   : > { %v1592_v4 = vpop.f32.mrf.mxu0  ;;  %2068 = vmatmul.mubr.bf16.gmra.mxu1 %v1703_v61 }
 0x2f8   : > { %v1593_v5 = vadd.f32 %v1592_v4, %v4194_v34  ;;  %v1669_v6 = vmax.f32 %v1591_v1, 0.0  ;;  %v3656_v1 = vld [vmem:[%s4612_s11 + $0x18] sm:$0xff]  }
 0x2f9   : > { %v1596_v7 = vpop.f32.mrf.mxu0 }
 0x2fa   : > { %v1670_v10 = vmax.f32 %v1593_v5, 0.0  ;;  %v1705_v14 = vpack.c.bf16 %v1669_v6, %v1667_v11  ;;  %v1597_v18 = vadd.f32 %v1596_v7, %v4197_v35  ;;  %v3657_v5 = vld [vmem:[%s4612_s11 + $0x50] sm:$0xff]  }
 0x2fb   : > { %v1598_v12 = vpop.f32.mrf.mxu0 }
 0x2fc   : > { %v1706_v13 = vpack.c.bf16 %v1670_v10, %v1668_v9  ;;  %v1599_v16 = vadd.f32 %v1598_v12, %v4194_v34  ;;  %v1671_v25 = vmax.f32 %v1597_v18, 0.0  ;;  %v3658_v12 = vld [vmem:[%s4612_s11 + $0x10] sm:$0xff]  }
 0x2fd   : > { %v1600_v15 = vpop.f32.mrf.mxu0 }
 0x2fe   : > { %v1601_v17 = vadd.f32 %v1600_v15, %v4197_v35  ;;  %2077 = vmatprep.mubr.bf16.mxu1 %v1706_v13  ;;  %v1672_v23 = vmax.f32 %v1599_v16, 0.0  ;;  %v3659_v15 = vld [vmem:[%s4612_s11 + $0x48] sm:$0xff]  }
 0x2ff   : > { %v1602_v19 = vpop.f32.mrf.mxu0  ;;  %2078 = vmatmul.mubr.bf16.gmra.mxu1 %v1705_v14 }
 0x300   : > { %v1603_v20 = vadd.f32 %v1602_v19, %v4194_v34  ;;  %v1673_v21 = vmax.f32 %v1601_v17, 0.0 }
 0x301   : > { %v1606_v22 = vpop.f32.mrf.mxu0 }
 0x302   : > { %v1674_v24 = vmax.f32 %v1603_v20, 0.0  ;;  %v1707_v26 = vpack.c.bf16 %v1673_v21, %v1671_v25  ;;  %v1607_v30 = vadd.f32 %v1606_v22, %v4197_v35  ;;  %v3660_v21 = vld [vmem:[%s4612_s11 + $0x8] sm:$0xff]  }
 0x303   : > { %v1608_v2 = vpop.f32.mrf.mxu0 }
 0x304   : > { %v1708_v8 = vpack.c.bf16 %v1674_v24, %v1672_v23  ;;  %v1609_v28 = vadd.f32 %v1608_v2, %v4194_v34  ;;  %v1675_v38 = vmax.f32 %v1607_v30, 0.0  ;;  %v3661_v24 = vld [vmem:[%s4612_s11 + $0x40] sm:$0xff]  }
 0x305   : > { %v1610_v27 = vpop.f32.mrf.mxu0 }
 0x306   : > { %v1611_v29 = vadd.f32 %v1610_v27, %v4197_v35  ;;  %2087 = vmatprep.mubr.bf16.mxu1 %v1708_v8  ;;  %v1676_v36 = vmax.f32 %v1609_v28, 0.0  ;;  %v3648_v35 = vld [vmem:[%s4612_s11 + $0x38] sm:$0xff]   ;;  %v3662_v28 = vld [vmem:[%s4612_s11] sm:$0xff]  }
 0x307   : > { %v1612_v31 = vpop.f32.mrf.mxu0  ;;  %2088 = vmatmul.mubr.bf16.gmra.mxu1 %v1707_v26 }
 0x308   : > { %v1613_v32 = vadd.f32 %v1612_v31, %v4194_v34  ;;  %v1677_v33 = vmax.f32 %v1611_v29, 0.0  ;;  %3351 = vmatpush3.bf16.msra.mxu1 %v3648_v35  ;;  %v3649_v34 = vld [vmem:[%s4612_s11 + $0x70] sm:$0xff]  }
 0x309   : > { %3352 = vmatprep.subr.bf16.mxu1 %v3649_v34 }
 0x30a   : > { %v1678_v37 = vmax.f32 %v1613_v32, 0.0  ;;  %v1709_v40 = vpack.c.bf16 %v1677_v33, %v1675_v38 }
 0x30c   : > { %v1710_v39 = vpack.c.bf16 %v1678_v37, %v1676_v36  ;;  %3353 = vmatpush3.bf16.msra.mxu1 %v3650_v42 }
 0x30d   : > { %3354 = vmatprep.subr.bf16.mxu1 %v3651_v43 }
 0x30e   : > { %2097 = vmatprep.mubr.bf16.mxu1 %v1710_v39 }
 0x30f   : > { %2098 = vmatmul.mubr.bf16.gmra.mxu1 %v1709_v40 }
 0x310   : > { %3355 = vmatpush3.bf16.msra.mxu1 %v3652_v47 }
 0x311   : > { %3356 = vmatprep.subr.bf16.mxu1 %v3653_v57 }
 0x314   : > { %3357 = vmatpush3.bf16.msra.mxu1 %v3654_v58 }
 0x315   : > { %3358 = vmatprep.subr.bf16.mxu1 %v3655_v62 }
 0x318   : > { %3359 = vmatpush3.bf16.msra.mxu1 %v3656_v1 }
 0x319   : > { %3360 = vmatprep.subr.bf16.mxu1 %v3657_v5 }
 0x31c   : > { %3361 = vmatpush3.bf16.msra.mxu1 %v3658_v12 }
 0x31d   : > { %3362 = vmatprep.subr.bf16.mxu1 %v3659_v15 }
 0x320   : > { %3363 = vmatpush3.bf16.msra.mxu1 %v3660_v21 }
 0x321   : > { %3364 = vmatprep.subr.bf16.mxu1 %v3661_v24 }
 0x324   : > { %3365 = vmatpush3.bf16.msra.mxu1 %v3662_v28 }
 0x357   : > { %v1949_v45 = vpop.f32.mrf.mxu1 }
 0x358   : > { %v1950_v53 = vadd.f32 %v1949_v45, %v4354_v48 }
 0x359   : > { %v1951_v49 = vpop.f32.mrf.mxu1 }
 0x35a   : > { %v1952_v51 = vadd.f32 %v1951_v49, %v4348_v46  ;;  %v2108_v3 = vmax.f32 %v1950_v53, 0.0 }
 0x35b   : > { %v1953_v50 = vpop.f32.mrf.mxu1 }
 0x35c   : > { %v1954_v52 = vadd.f32 %v1953_v50, %v4354_v48  ;;  %v2109_v63 = vmax.f32 %v1952_v51, 0.0 }
 0x35d   : > { %v1955_v54 = vpop.f32.mrf.mxu1 }
 0x35e   : > { %v1956_v59 = vadd.f32 %v1955_v54, %v4348_v46  ;;  %v2110_v60 = vmax.f32 %v1954_v52, 0.0 }
 0x35f   : > { %v1959_v61 = vpop.f32.mrf.mxu1 }
 0x360   : > { %v2111_v0 = vmax.f32 %v1956_v59, 0.0  ;;  %v2172_v7 = vpack.c.bf16 %v2110_v60, %v2108_v3  ;;  %v1960_v13 = vadd.f32 %v1959_v61, %v4354_v48 }
 0x361   : > { %v1961_v4 = vpop.f32.mrf.mxu1 }
 0x362   : > { %v2173_v6 = vpack.c.bf16 %v2111_v0, %v2109_v63  ;;  %v1962_v10 = vadd.f32 %v1961_v4, %v4348_v46  ;;  %v2112_v22 = vmax.f32 %v1960_v13, 0.0 }
 0x363   : > { %v1963_v9 = vpop.f32.mrf.mxu1 }
 0x364   : > { %v1964_v11 = vadd.f32 %v1963_v9, %v4354_v48  ;;  %2440 = vmatprep.mubr.bf16.mxu0 %v2173_v6  ;;  %v2113_v19 = vmax.f32 %v1962_v10, 0.0 }
 0x365   : > { %v1965_v14 = vpop.f32.mrf.mxu1  ;;  %2441 = vmatmul.mubr.bf16.vlgmr.msra.gmra.mxu0 %v2172_v7 }
 0x366   : > { %v1966_v16 = vadd.f32 %v1965_v14, %v4348_v46  ;;  %v2114_v17 = vmax.f32 %v1964_v11, 0.0 }
 0x367   : > { %v1969_v18 = vpop.f32.mrf.mxu1 }
 0x368   : > { %v2115_v20 = vmax.f32 %v1966_v16, 0.0  ;;  %v2174_v2 = vpack.c.bf16 %v2114_v17, %v2112_v22  ;;  %v1970_v29 = vadd.f32 %v1969_v18, %v4354_v48 }
 0x369   : > { %v1971_v23 = vpop.f32.mrf.mxu1 }
 0x36a   : > { %v2175_v25 = vpack.c.bf16 %v2115_v20, %v2113_v19  ;;  %v1972_v26 = vadd.f32 %v1971_v23, %v4348_v46  ;;  %v2116_v38 = vmax.f32 %v1970_v29, 0.0 }
 0x36b   : > { %v1973_v8 = vpop.f32.mrf.mxu1 }
 0x36c   : > { %v1974_v27 = vadd.f32 %v1973_v8, %v4354_v48  ;;  %2450 = vmatprep.mubr.bf16.mxu0 %v2175_v25  ;;  %v2117_v36 = vmax.f32 %v1972_v26, 0.0 }
 0x36d   : > { %v1975_v30 = vpop.f32.mrf.mxu1  ;;  %2451 = vmatmul.mubr.bf16.gmra.mxu0 %v2174_v2 }
 0x36e   : > { %v1976_v31 = vadd.f32 %v1975_v30, %v4348_v46  ;;  %v2118_v32 = vmax.f32 %v1974_v27, 0.0 }
 0x36f   : > { %v1979_v33 = vpop.f32.mrf.mxu1 }
 0x370   : > { %v2119_v37 = vmax.f32 %v1976_v31, 0.0  ;;  %v2176_v41 = vpack.c.bf16 %v2118_v32, %v2116_v38  ;;  %v1980_v43 = vadd.f32 %v1979_v33, %v4354_v48 }
 0x371   : > { %v1981_v39 = vpop.f32.mrf.mxu1 }
 0x372   : > { %v2177_v40 = vpack.c.bf16 %v2119_v37, %v2117_v36  ;;  %v1982_v34 = vadd.f32 %v1981_v39, %v4348_v46  ;;  %v2120_v52 = vmax.f32 %v1980_v43, 0.0 }
 0x373   : > { %v1983_v35 = vpop.f32.mrf.mxu1 }
 0x374   : > { %v1984_v42 = vadd.f32 %v1983_v35, %v4354_v48  ;;  %2460 = vmatprep.mubr.bf16.mxu0 %v2177_v40  ;;  %v2121_v50 = vmax.f32 %v1982_v34, 0.0 }
 0x375   : > { %v1985_v44 = vpop.f32.mrf.mxu1  ;;  %2461 = vmatmul.mubr.bf16.gmra.mxu0 %v2176_v41 }
 0x376   : > { %v1986_v45 = vadd.f32 %v1985_v44, %v4348_v46  ;;  %v2122_v47 = vmax.f32 %v1984_v42, 0.0 }
 0x377   : > { %v1989_v49 = vpop.f32.mrf.mxu1 }
 0x378   : > { %v2123_v51 = vmax.f32 %v1986_v45, 0.0  ;;  %v2178_v57 = vpack.c.bf16 %v2122_v47, %v2120_v52  ;;  %v1990_v60 = vadd.f32 %v1989_v49, %v4354_v48 }
 0x379   : > { %v1991_v53 = vpop.f32.mrf.mxu1 }
 0x37a   : > { %v2179_v54 = vpack.c.bf16 %v2123_v51, %v2121_v50  ;;  %v1992_v62 = vadd.f32 %v1991_v53, %v4348_v46  ;;  %v2124_v5 = vmax.f32 %v1990_v60, 0.0 }
 0x37b   : > { %v1993_v58 = vpop.f32.mrf.mxu1 }
 0x37c   : > { %v1994_v59 = vadd.f32 %v1993_v58, %v4354_v48  ;;  %2470 = vmatprep.mubr.bf16.mxu0 %v2179_v54  ;;  %v2125_v3 = vmax.f32 %v1992_v62, 0.0 }
 0x37d   : > { %v1995_v61 = vpop.f32.mrf.mxu1  ;;  %2471 = vmatmul.mubr.bf16.gmra.mxu0 %v2178_v57 }
 0x37e   : > { %v1996_v63 = vadd.f32 %v1995_v61, %v4348_v46  ;;  %v2126_v0 = vmax.f32 %v1994_v59, 0.0 }
 0x37f   : > { %v1999_v1 = vpop.f32.mrf.mxu1 }
 0x380   : > { %v2127_v4 = vmax.f32 %v1996_v63, 0.0  ;;  %v2180_v9 = vpack.c.bf16 %v2126_v0, %v2124_v5  ;;  %v2000_v13 = vadd.f32 %v1999_v1, %v4354_v48 }
 0x381   : > { %v2001_v6 = vpop.f32.mrf.mxu1 }
 0x382   : > { %v2181_v7 = vpack.c.bf16 %v2127_v4, %v2125_v3  ;;  %v2002_v11 = vadd.f32 %v2001_v6, %v4348_v46  ;;  %v2128_v20 = vmax.f32 %v2000_v13, 0.0 }
 0x383   : > { %v2003_v10 = vpop.f32.mrf.mxu1 }
 0x384   : > { %v2004_v12 = vadd.f32 %v2003_v10, %v4354_v48  ;;  %2480 = vmatprep.mubr.bf16.mxu0 %v2181_v7  ;;  %v2129_v18 = vmax.f32 %v2002_v11, 0.0 }
 0x385   : > { %v2005_v14 = vpop.f32.mrf.mxu1  ;;  %2481 = vmatmul.mubr.bf16.gmra.mxu0 %v2180_v9 }
 0x386   : > { %v2006_v15 = vadd.f32 %v2005_v14, %v4348_v46  ;;  %v2130_v16 = vmax.f32 %v2004_v12, 0.0 }
 0x387   : > { %v2009_v17 = vpop.f32.mrf.mxu1 }
 0x388   : > { %v2131_v19 = vmax.f32 %v2006_v15, 0.0  ;;  %v2182_v23 = vpack.c.bf16 %v2130_v16, %v2128_v20  ;;  %v2010_v8 = vadd.f32 %v2009_v17, %v4354_v48 }
 0x389   : > { %v2011_v21 = vpop.f32.mrf.mxu1 }
 0x38a   : > { %v2183_v22 = vpack.c.bf16 %v2131_v19, %v2129_v18  ;;  %v2012_v25 = vadd.f32 %v2011_v21, %v4348_v46  ;;  %v2132_v32 = vmax.f32 %v2010_v8, 0.0 }
 0x38b   : > { %v2013_v24 = vpop.f32.mrf.mxu1 }
 0x38c   : > { %v2014_v2 = vadd.f32 %v2013_v24, %v4354_v48  ;;  %2490 = vmatprep.mubr.bf16.mxu0 %v2183_v22  ;;  %v2133_v30 = vmax.f32 %v2012_v25, 0.0 }
 0x38d   : > { %v2015_v26 = vpop.f32.mrf.mxu1  ;;  %2491 = vmatmul.mubr.bf16.gmra.mxu0 %v2182_v23 }
 0x38e   : > { %v2016_v27 = vadd.f32 %v2015_v26, %v4348_v46  ;;  %v2134_v28 = vmax.f32 %v2014_v2, 0.0 }
 0x38f   : > { %v2019_v29 = vpop.f32.mrf.mxu1 }
 0x390   : > { %v2135_v31 = vmax.f32 %v2016_v27, 0.0  ;;  %v2184_v37 = vpack.c.bf16 %v2134_v28, %v2132_v32  ;;  %v2020_v41 = vadd.f32 %v2019_v29, %v4354_v48 }
 0x391   : > { %v2021_v33 = vpop.f32.mrf.mxu1 }
 0x392   : > { %v2185_v36 = vpack.c.bf16 %v2135_v31, %v2133_v30  ;;  %v2022_v39 = vadd.f32 %v2021_v33, %v4348_v46  ;;  %v2136_v47 = vmax.f32 %v2020_v41, 0.0 }
 0x393   : > { %v2023_v38 = vpop.f32.mrf.mxu1 }
 0x394   : > { %v2024_v40 = vadd.f32 %v2023_v38, %v4354_v48  ;;  %2500 = vmatprep.mubr.bf16.mxu0 %v2185_v36  ;;  %v2137_v44 = vmax.f32 %v2022_v39, 0.0 }
 0x395   : > { %v2025_v35 = vpop.f32.mrf.mxu1  ;;  %2501 = vmatmul.mubr.bf16.gmra.mxu0 %v2184_v37 }
 0x396   : > { %v2026_v34 = vadd.f32 %v2025_v35, %v4348_v46  ;;  %v2138_v42 = vmax.f32 %v2024_v40, 0.0 }
 0x397   : > { %v2029_v43 = vpop.f32.mrf.mxu1 }
 0x398   : > { %v2139_v45 = vmax.f32 %v2026_v34, 0.0  ;;  %v2186_v51 = vpack.c.bf16 %v2138_v42, %v2136_v47  ;;  %v2030_v57 = vadd.f32 %v2029_v43, %v4354_v48 }
 0x399   : > { %v2031_v49 = vpop.f32.mrf.mxu1 }
 0x39a   : > { %v2187_v50 = vpack.c.bf16 %v2139_v45, %v2137_v44  ;;  %v2032_v53 = vadd.f32 %v2031_v49, %v4348_v46  ;;  %v2140_v0 = vmax.f32 %v2030_v57, 0.0 }
 0x39b   : > { %v2033_v52 = vpop.f32.mrf.mxu1 }
 0x39c   : > { %v2034_v54 = vadd.f32 %v2033_v52, %v4354_v48  ;;  %2510 = vmatprep.mubr.bf16.mxu0 %v2187_v50  ;;  %v2141_v61 = vmax.f32 %v2032_v53, 0.0 }
 0x39d   : > { %v2035_v58 = vpop.f32.mrf.mxu1  ;;  %2511 = vmatmul.mubr.bf16.gmra.mxu0 %v2186_v51 }
 0x39e   : > { %v2036_v62 = vadd.f32 %v2035_v58, %v4348_v46  ;;  %v2142_v59 = vmax.f32 %v2034_v54, 0.0 }
 0x39f   : > { %v2039_v60 = vpop.f32.mrf.mxu1 }
 0x3a0   : > { %v2143_v63 = vmax.f32 %v2036_v62, 0.0  ;;  %v2188_v4 = vpack.c.bf16 %v2142_v59, %v2140_v0  ;;  %v2040_v9 = vadd.f32 %v2039_v60, %v4354_v48 }
 0x3a1   : > { %v2041_v1 = vpop.f32.mrf.mxu1 }
 0x3a2   : > { %v2189_v3 = vpack.c.bf16 %v2143_v63, %v2141_v61  ;;  %v2042_v6 = vadd.f32 %v2041_v1, %v4348_v46  ;;  %v2144_v16 = vmax.f32 %v2040_v9, 0.0 }
 0x3a3   : > { %v2043_v5 = vpop.f32.mrf.mxu1 }
 0x3a4   : > { %v2044_v7 = vadd.f32 %v2043_v5, %v4354_v48  ;;  %2520 = vmatprep.mubr.bf16.mxu0 %v2189_v3  ;;  %v2145_v14 = vmax.f32 %v2042_v6, 0.0 }
 0x3a5   : > { %v2045_v10 = vpop.f32.mrf.mxu1  ;;  %2521 = vmatmul.mubr.bf16.gmra.mxu0 %v2188_v4 }
 0x3a6   : > { %v2046_v11 = vadd.f32 %v2045_v10, %v4348_v46  ;;  %v2146_v12 = vmax.f32 %v2044_v7, 0.0 }
 0x3a7   : > { %v2049_v13 = vpop.f32.mrf.mxu1 }
 0x3a8   : > { %v2147_v15 = vmax.f32 %v2046_v11, 0.0  ;;  %v2190_v19 = vpack.c.bf16 %v2146_v12, %v2144_v16  ;;  %v2050_v23 = vadd.f32 %v2049_v13, %v4354_v48 }
 0x3a9   : > { %v2051_v17 = vpop.f32.mrf.mxu1 }
 0x3aa   : > { %v2191_v18 = vpack.c.bf16 %v2147_v15, %v2145_v14  ;;  %v2052_v21 = vadd.f32 %v2051_v17, %v4348_v46  ;;  %v2148_v28 = vmax.f32 %v2050_v23, 0.0 }
 0x3ab   : > { %v2053_v20 = vpop.f32.mrf.mxu1 }
 0x3ac   : > { %v2054_v22 = vadd.f32 %v2053_v20, %v4354_v48  ;;  %2530 = vmatprep.mubr.bf16.mxu0 %v2191_v18  ;;  %v2149_v26 = vmax.f32 %v2052_v21, 0.0 }
 0x3ad   : > { %v2055_v24 = vpop.f32.mrf.mxu1  ;;  %2531 = vmatmul.mubr.bf16.gmra.mxu0 %v2190_v19 }
 0x3ae   : > { %v2056_v25 = vadd.f32 %v2055_v24, %v4348_v46  ;;  %v2150_v2 = vmax.f32 %v2054_v22, 0.0 }
 0x3af   : > { %v2059_v8 = vpop.f32.mrf.mxu1 }
 0x3b0   : > { %v2151_v27 = vmax.f32 %v2056_v25, 0.0  ;;  %v2192_v31 = vpack.c.bf16 %v2150_v2, %v2148_v28  ;;  %v2060_v37 = vadd.f32 %v2059_v8, %v4354_v48 }
 0x3b1   : > { %v2061_v29 = vpop.f32.mrf.mxu1 }
 0x3b2   : > { %v2193_v30 = vpack.c.bf16 %v2151_v27, %v2149_v26  ;;  %v2062_v33 = vadd.f32 %v2061_v29, %v4348_v46  ;;  %v2152_v42 = vmax.f32 %v2060_v37, 0.0 }
 0x3b3   : > { %v2063_v32 = vpop.f32.mrf.mxu1 }
 0x3b4   : > { %v2064_v36 = vadd.f32 %v2063_v32, %v4354_v48  ;;  %2540 = vmatprep.mubr.bf16.mxu0 %v2193_v30  ;;  %v2153_v35 = vmax.f32 %v2062_v33, 0.0 }
 0x3b5   : > { %v2065_v38 = vpop.f32.mrf.mxu1  ;;  %2541 = vmatmul.mubr.bf16.gmra.mxu0 %v2192_v31 }
 0x3b6   : > { %v2066_v39 = vadd.f32 %v2065_v38, %v4348_v46  ;;  %v2154_v40 = vmax.f32 %v2064_v36, 0.0 }
 0x3b7   : > { %v2069_v41 = vpop.f32.mrf.mxu1 }
 0x3b8   : > { %v2155_v34 = vmax.f32 %v2066_v39, 0.0  ;;  %v2194_v45 = vpack.c.bf16 %v2154_v40, %v2152_v42  ;;  %v2070_v51 = vadd.f32 %v2069_v41, %v4354_v48 }
 0x3b9   : > { %v2071_v43 = vpop.f32.mrf.mxu1 }
 0x3ba   : > { %v2195_v44 = vpack.c.bf16 %v2155_v34, %v2153_v35  ;;  %v2072_v49 = vadd.f32 %v2071_v43, %v4348_v46  ;;  %v2156_v59 = vmax.f32 %v2070_v51, 0.0  ;;  %v2236_v35 = vld [vmem:[%s4611_s10] sm:$0x3] }
 0x3bb   : > { %v2073_v47 = vpop.f32.mrf.mxu1  ;;  %v4454_v42 = vrot.slane %v2236_v35, %v3899_v55 }
 0x3bc   : > { %v2074_v50 = vadd.f32 %v2073_v47, %v4354_v48  ;;  %2550 = vmatprep.mubr.bf16.mxu0 %v2195_v44  ;;  %v2157_v58 = vmax.f32 %v2072_v49, 0.0 }
 0x3bd   : > { %v2075_v52 = vpop.f32.mrf.mxu1  ;;  %2551 = vmatmul.mubr.bf16.gmra.mxu0 %v2194_v45 }
 0x3be   : > { %v2076_v53 = vadd.f32 %v2075_v52, %v4348_v46  ;;  %v2158_v54 = vmax.f32 %v2074_v50, 0.0 }
 0x3bf   : > { %v2079_v57 = vpop.f32.mrf.mxu1 }
 0x3c0   : > { %v2159_v62 = vmax.f32 %v2076_v53, 0.0  ;;  %v2196_v63 = vpack.c.bf16 %v2158_v54, %v2156_v59  ;;  %v2080_v4 = vadd.f32 %v2079_v57, %v4354_v48 }
 0x3c1   : > { %v2081_v60 = vpop.f32.mrf.mxu1 }
 0x3c2   : > { %v2197_v61 = vpack.c.bf16 %v2159_v62, %v2157_v58  ;;  %v2082_v1 = vadd.f32 %v2081_v60, %v4348_v46  ;;  %v2160_v12 = vmax.f32 %v2080_v4, 0.0 }
 0x3c3   : > { %v2083_v0 = vpop.f32.mrf.mxu1 }
 0x3c4   : > { %v2084_v3 = vadd.f32 %v2083_v0, %v4354_v48  ;;  %2560 = vmatprep.mubr.bf16.mxu0 %v2197_v61  ;;  %v2161_v10 = vmax.f32 %v2082_v1, 0.0 }
 0x3c5   : > { %v2085_v5 = vpop.f32.mrf.mxu1  ;;  %2561 = vmatmul.mubr.bf16.gmra.mxu0 %v2196_v63 }
 0x3c6   : > { %v2086_v6 = vadd.f32 %v2085_v5, %v4348_v46  ;;  %v2162_v7 = vmax.f32 %v2084_v3, 0.0 }
 0x3c7   : > { %v2089_v9 = vpop.f32.mrf.mxu1 }
 0x3c8   : > { %v2163_v11 = vmax.f32 %v2086_v6, 0.0  ;;  %v2198_v15 = vpack.c.bf16 %v2162_v7, %v2160_v12  ;;  %v2090_v19 = vadd.f32 %v2089_v9, %v4354_v48 }
 0x3c9   : > { %v2091_v13 = vpop.f32.mrf.mxu1 }
 0x3ca   : > { %v2199_v14 = vpack.c.bf16 %v2163_v11, %v2161_v10  ;;  %v2092_v17 = vadd.f32 %v2091_v13, %v4348_v46  ;;  %v2164_v2 = vmax.f32 %v2090_v19, 0.0 }
 0x3cb   : > { %v2093_v16 = vpop.f32.mrf.mxu1 }
 0x3cc   : > { %v2094_v18 = vadd.f32 %v2093_v16, %v4354_v48  ;;  %2570 = vmatprep.mubr.bf16.mxu0 %v2199_v14  ;;  %v2165_v24 = vmax.f32 %v2092_v17, 0.0 }
 0x3cd   : > { %v2095_v20 = vpop.f32.mrf.mxu1  ;;  %2571 = vmatmul.mubr.bf16.gmra.mxu0 %v2198_v15 }
 0x3ce   : > { %v2096_v21 = vadd.f32 %v2095_v20, %v4348_v46  ;;  %v2166_v22 = vmax.f32 %v2094_v18, 0.0 }
 0x3cf   : > { %v2099_v23 = vpop.f32.mrf.mxu1 }
 0x3d0   : > { %v2167_v25 = vmax.f32 %v2096_v21, 0.0  ;;  %v2200_v27 = vpack.c.bf16 %v2166_v22, %v2164_v2  ;;  %v2100_v31 = vadd.f32 %v2099_v23, %v4354_v48 }
 0x3d1   : > { %v2101_v8 = vpop.f32.mrf.mxu1 }
 0x3d2   : > { %v2201_v26 = vpack.c.bf16 %v2167_v25, %v2165_v24  ;;  %v2102_v29 = vadd.f32 %v2101_v8, %v4348_v46  ;;  %v2168_v39 = vmax.f32 %v2100_v31, 0.0 }
 0x3d3   : > { %v2103_v28 = vpop.f32.mrf.mxu1 }
 0x3d4   : > { %v2104_v30 = vadd.f32 %v2103_v28, %v4354_v48  ;;  %2580 = vmatprep.mubr.bf16.mxu0 %v2201_v26  ;;  %v2169_v37 = vmax.f32 %v2102_v29, 0.0  ;;  %v4457_v48 = vrot.slane %v2236_v35, %v3901_v56 }
 0x3d5   : > { %v2105_v32 = vpop.f32.mrf.mxu1  ;;  %2581 = vmatmul.mubr.bf16.gmra.mxu0 %v2200_v27 }
 0x3d6   : > { %v2106_v33 = vadd.f32 %v2105_v32, %v4348_v46  ;;  %v2170_v36 = vmax.f32 %v2104_v30, 0.0 }
 0x3d8   : > { %v2171_v38 = vmax.f32 %v2106_v33, 0.0  ;;  %v2202_v41 = vpack.c.bf16 %v2170_v36, %v2168_v39 }
 0x3da   : > { %v2203_v40 = vpack.c.bf16 %v2171_v38, %v2169_v37 }
 0x3dc   : > { %2590 = vmatprep.mubr.bf16.mxu0 %v2203_v40 }
 0x3dd   : > { %2591 = vmatmul.mubr.bf16.gmra.mxu0 %v2202_v41 }
 0x425   : > { %v2442_v34 = vpop.f32.mrf.mxu0 }
 0x426   : > { %v2443_v47 = vadd.f32 %v2442_v34, %v4457_v48 }
 0x427   : > { %v2444_v46 = vpop.f32.mrf.mxu0 }
 0x428   : > { %v2445_v44 = vadd.f32 %v2444_v46, %v4454_v42  ;;  %v2601_v55 = vmax.f32 %v2443_v47, 0.0 }
 0x429   : > { %v2446_v43 = vpop.f32.mrf.mxu0 }
 0x42a   : > { %v2447_v45 = vadd.f32 %v2446_v43, %v4457_v48  ;;  %v2602_v53 = vmax.f32 %v2445_v44, 0.0 }
 0x42b   : > { %v2448_v49 = vpop.f32.mrf.mxu0 }
 0x42c   : > { %v2449_v50 = vadd.f32 %v2448_v49, %v4454_v42  ;;  %v2603_v51 = vmax.f32 %v2447_v45, 0.0 }
 0x42d   : > { %v2452_v52 = vpop.f32.mrf.mxu0 }
 0x42e   : > { %v2604_v54 = vmax.f32 %v2449_v50, 0.0  ;;  %v2665_v56 = vpack.c.bf16 %v2603_v51, %v2601_v55  ;;  %v2453_v61 = vadd.f32 %v2452_v52, %v4457_v48 }
 0x42f   : > { %v2454_v57 = vpop.f32.mrf.mxu0 }
 0x430   : > { %v2666_v58 = vpack.c.bf16 %v2604_v54, %v2602_v53  ;;  %v2455_v59 = vadd.f32 %v2454_v57, %v4454_v42  ;;  %v2605_v6 = vmax.f32 %v2453_v61, 0.0 }
 0x431   : > { %v2456_v62 = vpop.f32.mrf.mxu0 }
 0x432   : > { %v2457_v60 = vadd.f32 %v2456_v62, %v4457_v48  ;;  %2864 = vmatprep.mubr.bf16.mxu1 %v2666_v58  ;;  %v2606_v4 = vmax.f32 %v2455_v59, 0.0 }
 0x433   : > { %v2458_v63 = vpop.f32.mrf.mxu0  ;;  %2865 = vmatmul.mubr.bf16.vlgmr.msra.gmra.mxu1 %v2665_v56 }
 0x434   : > { %v2459_v0 = vadd.f32 %v2458_v63, %v4454_v42  ;;  %v2607_v1 = vmax.f32 %v2457_v60, 0.0 }
 0x435   : > { %v2462_v3 = vpop.f32.mrf.mxu0 }
 0x436   : > { %v2608_v5 = vmax.f32 %v2459_v0, 0.0  ;;  %v2667_v10 = vpack.c.bf16 %v2607_v1, %v2605_v6  ;;  %v2463_v14 = vadd.f32 %v2462_v3, %v4457_v48 }
 0x437   : > { %v2464_v7 = vpop.f32.mrf.mxu0 }
 0x438   : > { %v2668_v9 = vpack.c.bf16 %v2608_v5, %v2606_v4  ;;  %v2465_v12 = vadd.f32 %v2464_v7, %v4454_v42  ;;  %v2609_v21 = vmax.f32 %v2463_v14, 0.0 }
 0x439   : > { %v2466_v11 = vpop.f32.mrf.mxu0 }
 0x43a   : > { %v2467_v13 = vadd.f32 %v2466_v11, %v4457_v48  ;;  %2872 = vmatprep.mubr.bf16.mxu1 %v2668_v9  ;;  %v2610_v19 = vmax.f32 %v2465_v12, 0.0 }
 0x43b   : > { %v2468_v15 = vpop.f32.mrf.mxu0  ;;  %2873 = vmatmul.mubr.bf16.gmra.mxu1 %v2667_v10 }
 0x43c   : > { %v2469_v16 = vadd.f32 %v2468_v15, %v4454_v42  ;;  %v2611_v17 = vmax.f32 %v2467_v13, 0.0 }
 0x43d   : > { %v2472_v18 = vpop.f32.mrf.mxu0 }
 0x43e   : > { %v2612_v20 = vmax.f32 %v2469_v16, 0.0  ;;  %v2669_v24 = vpack.c.bf16 %v2611_v17, %v2609_v21  ;;  %v2473_v26 = vadd.f32 %v2472_v18, %v4457_v48 }
 0x43f   : > { %v2474_v22 = vpop.f32.mrf.mxu0 }
 0x440   : > { %v2670_v23 = vpack.c.bf16 %v2612_v20, %v2610_v19  ;;  %v2475_v2 = vadd.f32 %v2474_v22, %v4454_v42  ;;  %v2613_v33 = vmax.f32 %v2473_v26, 0.0 }
 0x441   : > { %v2476_v25 = vpop.f32.mrf.mxu0 }
 0x442   : > { %v2477_v8 = vadd.f32 %v2476_v25, %v4457_v48  ;;  %2880 = vmatprep.mubr.bf16.mxu1 %v2670_v23  ;;  %v2614_v31 = vmax.f32 %v2475_v2, 0.0 }
 0x443   : > { %v2478_v27 = vpop.f32.mrf.mxu0  ;;  %2881 = vmatmul.mubr.bf16.gmra.mxu1 %v2669_v24 }
 0x444   : > { %v2479_v28 = vadd.f32 %v2478_v27, %v4454_v42  ;;  %v2615_v29 = vmax.f32 %v2477_v8, 0.0 }
 0x445   : > { %v2482_v30 = vpop.f32.mrf.mxu0 }
 0x446   : > { %v2616_v32 = vmax.f32 %v2479_v28, 0.0  ;;  %v2671_v38 = vpack.c.bf16 %v2615_v29, %v2613_v33  ;;  %v2483_v35 = vadd.f32 %v2482_v30, %v4457_v48 }
 0x447   : > { %v2484_v36 = vpop.f32.mrf.mxu0 }
 0x448   : > { %v2672_v37 = vpack.c.bf16 %v2616_v32, %v2614_v31  ;;  %v2485_v40 = vadd.f32 %v2484_v36, %v4454_v42  ;;  %v2617_v49 = vmax.f32 %v2483_v35, 0.0 }
 0x449   : > { %v2486_v39 = vpop.f32.mrf.mxu0 }
 0x44a   : > { %v2487_v41 = vadd.f32 %v2486_v39, %v4457_v48  ;;  %2888 = vmatprep.mubr.bf16.mxu1 %v2672_v37  ;;  %v2618_v45 = vmax.f32 %v2485_v40, 0.0 }
 0x44b   : > { %v2488_v34 = vpop.f32.mrf.mxu0  ;;  %2889 = vmatmul.mubr.bf16.gmra.mxu1 %v2671_v38 }
 0x44c   : > { %v2489_v46 = vadd.f32 %v2488_v34, %v4454_v42  ;;  %v2619_v43 = vmax.f32 %v2487_v41, 0.0 }
 0x44d   : > { %v2492_v44 = vpop.f32.mrf.mxu0 }
 0x44e   : > { %v2620_v47 = vmax.f32 %v2489_v46, 0.0  ;;  %v2673_v52 = vpack.c.bf16 %v2619_v43, %v2617_v49  ;;  %v2493_v57 = vadd.f32 %v2492_v44, %v4457_v48 }
 0x44f   : > { %v2494_v50 = vpop.f32.mrf.mxu0 }
 0x450   : > { %v2674_v51 = vpack.c.bf16 %v2620_v47, %v2618_v45  ;;  %v2495_v54 = vadd.f32 %v2494_v50, %v4454_v42  ;;  %v2621_v63 = vmax.f32 %v2493_v57, 0.0 }
 0x451   : > { %v2496_v53 = vpop.f32.mrf.mxu0 }
 0x452   : > { %v2497_v55 = vadd.f32 %v2496_v53, %v4457_v48  ;;  %2896 = vmatprep.mubr.bf16.mxu1 %v2674_v51  ;;  %v2622_v60 = vmax.f32 %v2495_v54, 0.0 }
 0x453   : > { %v2498_v58 = vpop.f32.mrf.mxu0  ;;  %2897 = vmatmul.mubr.bf16.gmra.mxu1 %v2673_v52 }
 0x454   : > { %v2499_v56 = vadd.f32 %v2498_v58, %v4454_v42  ;;  %v2623_v62 = vmax.f32 %v2497_v55, 0.0 }
 0x455   : > { %v2502_v59 = vpop.f32.mrf.mxu0 }
 0x456   : > { %v2624_v61 = vmax.f32 %v2499_v56, 0.0  ;;  %v2675_v3 = vpack.c.bf16 %v2623_v62, %v2621_v63  ;;  %v2503_v7 = vadd.f32 %v2502_v59, %v4457_v48 }
 0x457   : > { %v2504_v0 = vpop.f32.mrf.mxu0 }
 0x458   : > { %v2676_v1 = vpack.c.bf16 %v2624_v61, %v2622_v60  ;;  %v2505_v5 = vadd.f32 %v2504_v0, %v4454_v42  ;;  %v2625_v15 = vmax.f32 %v2503_v7, 0.0 }
 0x459   : > { %v2506_v4 = vpop.f32.mrf.mxu0 }
 0x45a   : > { %v2507_v6 = vadd.f32 %v2506_v4, %v4457_v48  ;;  %2904 = vmatprep.mubr.bf16.mxu1 %v2676_v1  ;;  %v2626_v13 = vmax.f32 %v2505_v5, 0.0 }
 0x45b   : > { %v2508_v9 = vpop.f32.mrf.mxu0  ;;  %2905 = vmatmul.mubr.bf16.gmra.mxu1 %v2675_v3 }
 0x45c   : > { %v2509_v10 = vadd.f32 %v2508_v9, %v4454_v42  ;;  %v2627_v11 = vmax.f32 %v2507_v6, 0.0 }
 0x45d   : > { %v2512_v12 = vpop.f32.mrf.mxu0 }
 0x45e   : > { %v2628_v14 = vmax.f32 %v2509_v10, 0.0  ;;  %v2677_v18 = vpack.c.bf16 %v2627_v11, %v2625_v15  ;;  %v2513_v22 = vadd.f32 %v2512_v12, %v4457_v48 }
 0x45f   : > { %v2514_v16 = vpop.f32.mrf.mxu0 }
 0x460   : > { %v2678_v17 = vpack.c.bf16 %v2628_v14, %v2626_v13  ;;  %v2515_v20 = vadd.f32 %v2514_v16, %v4454_v42  ;;  %v2629_v27 = vmax.f32 %v2513_v22, 0.0 }
 0x461   : > { %v2516_v19 = vpop.f32.mrf.mxu0 }
 0x462   : > { %v2517_v21 = vadd.f32 %v2516_v19, %v4457_v48  ;;  %2912 = vmatprep.mubr.bf16.mxu1 %v2678_v17  ;;  %v2630_v8 = vmax.f32 %v2515_v20, 0.0 }
 0x463   : > { %v2518_v23 = vpop.f32.mrf.mxu0  ;;  %2913 = vmatmul.mubr.bf16.gmra.mxu1 %v2677_v18 }
 0x464   : > { %v2519_v24 = vadd.f32 %v2518_v23, %v4454_v42  ;;  %v2631_v25 = vmax.f32 %v2517_v21, 0.0 }
 0x465   : > { %v2522_v2 = vpop.f32.mrf.mxu0 }
 0x466   : > { %v2632_v26 = vmax.f32 %v2519_v24, 0.0  ;;  %v2679_v30 = vpack.c.bf16 %v2631_v25, %v2629_v27  ;;  %v2523_v36 = vadd.f32 %v2522_v2, %v4457_v48 }
 0x467   : > { %v2524_v28 = vpop.f32.mrf.mxu0 }
 0x468   : > { %v2680_v29 = vpack.c.bf16 %v2632_v26, %v2630_v8  ;;  %v2525_v32 = vadd.f32 %v2524_v28, %v4454_v42  ;;  %v2633_v34 = vmax.f32 %v2523_v36, 0.0 }
 0x469   : > { %v2526_v31 = vpop.f32.mrf.mxu0 }
 0x46a   : > { %v2527_v33 = vadd.f32 %v2526_v31, %v4457_v48  ;;  %2920 = vmatprep.mubr.bf16.mxu1 %v2680_v29  ;;  %v2634_v41 = vmax.f32 %v2525_v32, 0.0 }
 0x46b   : > { %v2528_v37 = vpop.f32.mrf.mxu0  ;;  %2921 = vmatmul.mubr.bf16.gmra.mxu1 %v2679_v30 }
 0x46c   : > { %v2529_v38 = vadd.f32 %v2528_v37, %v4454_v42  ;;  %v2635_v39 = vmax.f32 %v2527_v33, 0.0 }
 0x46d   : > { %v2532_v40 = vpop.f32.mrf.mxu0 }
 0x46e   : > { %v2636_v35 = vmax.f32 %v2529_v38, 0.0  ;;  %v2681_v44 = vpack.c.bf16 %v2635_v39, %v2633_v34  ;;  %v2533_v50 = vadd.f32 %v2532_v40, %v4457_v48 }
 0x46f   : > { %v2534_v46 = vpop.f32.mrf.mxu0 }
 0x470   : > { %v2682_v43 = vpack.c.bf16 %v2636_v35, %v2634_v41  ;;  %v2535_v47 = vadd.f32 %v2534_v46, %v4454_v42  ;;  %v2637_v58 = vmax.f32 %v2533_v50, 0.0 }
 0x471   : > { %v2536_v45 = vpop.f32.mrf.mxu0 }
 0x472   : > { %v2537_v49 = vadd.f32 %v2536_v45, %v4457_v48  ;;  %2928 = vmatprep.mubr.bf16.mxu1 %v2682_v43  ;;  %v2638_v55 = vmax.f32 %v2535_v47, 0.0 }
 0x473   : > { %v2538_v51 = vpop.f32.mrf.mxu0  ;;  %2929 = vmatmul.mubr.bf16.gmra.mxu1 %v2681_v44 }
 0x474   : > { %v2539_v52 = vadd.f32 %v2538_v51, %v4454_v42  ;;  %v2639_v53 = vmax.f32 %v2537_v49, 0.0 }
 0x475   : > { %v2542_v54 = vpop.f32.mrf.mxu0 }
 0x476   : > { %v2640_v57 = vmax.f32 %v2539_v52, 0.0  ;;  %v2683_v59 = vpack.c.bf16 %v2639_v53, %v2637_v58  ;;  %v2543_v0 = vadd.f32 %v2542_v54, %v4457_v48 }
 0x477   : > { %v2544_v56 = vpop.f32.mrf.mxu0 }
 0x478   : > { %v2684_v62 = vpack.c.bf16 %v2640_v57, %v2638_v55  ;;  %v2545_v61 = vadd.f32 %v2544_v56, %v4454_v42  ;;  %v2641_v9 = vmax.f32 %v2543_v0, 0.0 }
 0x479   : > { %v2546_v60 = vpop.f32.mrf.mxu0 }
 0x47a   : > { %v2547_v63 = vadd.f32 %v2546_v60, %v4457_v48  ;;  %2936 = vmatprep.mubr.bf16.mxu1 %v2684_v62  ;;  %v2642_v6 = vmax.f32 %v2545_v61, 0.0 }
 0x47b   : > { %v2548_v1 = vpop.f32.mrf.mxu0  ;;  %2937 = vmatmul.mubr.bf16.gmra.mxu1 %v2683_v59 }
 0x47c   : > { %v2549_v3 = vadd.f32 %v2548_v1, %v4454_v42  ;;  %v2643_v4 = vmax.f32 %v2547_v63, 0.0 }
 0x47d   : > { %v2552_v5 = vpop.f32.mrf.mxu0 }
 0x47e   : > { %v2644_v7 = vmax.f32 %v2549_v3, 0.0  ;;  %v2685_v12 = vpack.c.bf16 %v2643_v4, %v2641_v9  ;;  %v2553_v16 = vadd.f32 %v2552_v5, %v4457_v48 }
 0x47f   : > { %v2554_v10 = vpop.f32.mrf.mxu0 }
 0x480   : > { %v2686_v11 = vpack.c.bf16 %v2644_v7, %v2642_v6  ;;  %v2555_v14 = vadd.f32 %v2554_v10, %v4454_v42  ;;  %v2645_v23 = vmax.f32 %v2553_v16, 0.0 }
 0x481   : > { %v2556_v13 = vpop.f32.mrf.mxu0 }
 0x482   : > { %v2557_v15 = vadd.f32 %v2556_v13, %v4457_v48  ;;  %2944 = vmatprep.mubr.bf16.mxu1 %v2686_v11  ;;  %v2646_v21 = vmax.f32 %v2555_v14, 0.0 }
 0x483   : > { %v2558_v17 = vpop.f32.mrf.mxu0  ;;  %2945 = vmatmul.mubr.bf16.gmra.mxu1 %v2685_v12 }
 0x484   : > { %v2559_v18 = vadd.f32 %v2558_v17, %v4454_v42  ;;  %v2647_v19 = vmax.f32 %v2557_v15, 0.0 }
 0x485   : > { %v2562_v20 = vpop.f32.mrf.mxu0 }
 0x486   : > { %v2648_v22 = vmax.f32 %v2559_v18, 0.0  ;;  %v2687_v2 = vpack.c.bf16 %v2647_v19, %v2645_v23  ;;  %v2563_v28 = vadd.f32 %v2562_v20, %v4457_v48  ;;  %v4527_v20 = vld [vmem:[%s4613_s12] ss:$0 sm:$0xff] }
 0x487   : > { %v2564_v24 = vpop.f32.mrf.mxu0 }
 0x488   : > { %v2688_v25 = vpack.c.bf16 %v2648_v22, %v2646_v21  ;;  %v2565_v26 = vadd.f32 %v2564_v24, %v4454_v42  ;;  %v2649_v37 = vmax.f32 %v2563_v28, 0.0 }
 0x489   : > { %v2566_v8 = vpop.f32.mrf.mxu0 }
 0x48a   : > { %v2567_v27 = vadd.f32 %v2566_v8, %v4457_v48  ;;  %2952 = vmatprep.mubr.bf16.mxu1 %v2688_v25  ;;  %v2650_v33 = vmax.f32 %v2565_v26, 0.0 }
 0x48b   : > { %v2568_v29 = vpop.f32.mrf.mxu0  ;;  %2953 = vmatmul.mubr.bf16.gmra.mxu1 %v2687_v2 }
 0x48c   : > { %v2569_v30 = vadd.f32 %v2568_v29, %v4454_v42  ;;  %v2651_v31 = vmax.f32 %v2567_v27, 0.0 }
 0x48d   : > { %v2572_v32 = vpop.f32.mrf.mxu0 }
 0x48e   : > { %v2652_v36 = vmax.f32 %v2569_v30, 0.0  ;;  %v2689_v40 = vpack.c.bf16 %v2651_v31, %v2649_v37  ;;  %v2573_v46 = vadd.f32 %v2572_v32, %v4457_v48 }
 0x48f   : > { %v2574_v38 = vpop.f32.mrf.mxu0 }
 0x490   : > { %v2690_v39 = vpack.c.bf16 %v2652_v36, %v2650_v33  ;;  %v2575_v35 = vadd.f32 %v2574_v38, %v4454_v42  ;;  %v2653_v51 = vmax.f32 %v2573_v46, 0.0 }
 0x491   : > { %v2576_v41 = vpop.f32.mrf.mxu0 }
 0x492   : > { %v2577_v34 = vadd.f32 %v2576_v41, %v4457_v48  ;;  %2960 = vmatprep.mubr.bf16.mxu1 %v2690_v39  ;;  %v2654_v49 = vmax.f32 %v2575_v35, 0.0 }
 0x493   : > { %v2578_v43 = vpop.f32.mrf.mxu0  ;;  %2961 = vmatmul.mubr.bf16.gmra.mxu1 %v2689_v40 }
 0x494   : > { %v2579_v44 = vadd.f32 %v2578_v43, %v4454_v42  ;;  %v2655_v45 = vmax.f32 %v2577_v34, 0.0 }
 0x495   : > { %v2582_v47 = vpop.f32.mrf.mxu0 }
 0x496   : > { %v2656_v50 = vmax.f32 %v2579_v44, 0.0  ;;  %v2691_v54 = vpack.c.bf16 %v2655_v45, %v2653_v51  ;;  %v2583_v56 = vadd.f32 %v2582_v47, %v4457_v48 }
 0x497   : > { %v2584_v52 = vpop.f32.mrf.mxu0 }
 0x498   : > { %v2692_v53 = vpack.c.bf16 %v2656_v50, %v2654_v49  ;;  %v2585_v57 = vadd.f32 %v2584_v52, %v4454_v42  ;;  %v2657_v1 = vmax.f32 %v2583_v56, 0.0 }
 0x499   : > { %v2586_v55 = vpop.f32.mrf.mxu0 }
 0x49a   : > { %v2587_v58 = vadd.f32 %v2586_v55, %v4457_v48  ;;  %2968 = vmatprep.mubr.bf16.mxu1 %v2692_v53  ;;  %v2658_v63 = vmax.f32 %v2585_v57, 0.0 }
 0x49b   : > { %v2588_v62 = vpop.f32.mrf.mxu0  ;;  %2969 = vmatmul.mubr.bf16.gmra.mxu1 %v2691_v54 }
 0x49c   : > { %v2589_v59 = vadd.f32 %v2588_v62, %v4454_v42  ;;  %v2659_v60 = vmax.f32 %v2587_v58, 0.0 }
 0x49d   : > { %v2592_v61 = vpop.f32.mrf.mxu0 }
 0x49e   : > { %v2660_v0 = vmax.f32 %v2589_v59, 0.0  ;;  %v2693_v5 = vpack.c.bf16 %v2659_v60, %v2657_v1  ;;  %v2593_v10 = vadd.f32 %v2592_v61, %v4457_v48 }
 0x49f   : > { %v2594_v3 = vpop.f32.mrf.mxu0 }
 0x4a0   : > { %v2694_v4 = vpack.c.bf16 %v2660_v0, %v2658_v63  ;;  %v2595_v7 = vadd.f32 %v2594_v3, %v4454_v42  ;;  %v2661_v16 = vmax.f32 %v2593_v10, 0.0 }
 0x4a1   : > { %v2596_v6 = vpop.f32.mrf.mxu0 }
 0x4a2   : > { %v2597_v9 = vadd.f32 %v2596_v6, %v4457_v48  ;;  %2976 = vmatprep.mubr.bf16.mxu1 %v2694_v4  ;;  %v2662_v14 = vmax.f32 %v2595_v7, 0.0 }
 0x4a3   : > { %v2598_v11 = vpop.f32.mrf.mxu0  ;;  %2977 = vmatmul.mubr.bf16.gmra.mxu1 %v2693_v5 }
 0x4a4   : > { %v2599_v12 = vadd.f32 %v2598_v11, %v4454_v42  ;;  %v2663_v13 = vmax.f32 %v2597_v9, 0.0 }
 0x4a6   : > { %v2664_v15 = vmax.f32 %v2599_v12, 0.0  ;;  %v2695_v18 = vpack.c.bf16 %v2663_v13, %v2661_v16 }
 0x4a8   : > { %v2696_v17 = vpack.c.bf16 %v2664_v15, %v2662_v14 }
 0x4aa   : > { %2984 = vmatprep.mubr.bf16.mxu1 %v2696_v17 }
 0x4ab   : > { %2985 = vmatmul.mubr.bf16.gmra.mxu1 %v2695_v18 }
 0x4f3   : > { %v3366_v19 = vpop.f32.mrf.mxu1 }
 0x4f5   : > { %v3367_v48 = vpop.f32.mrf.mxu1 }
 0x4f6   : > { %v3368_v21 = vadd.f32 %v3367_v48, %v3366_v19 }
 0x4f7   : > { %v3369_v42 = vpop.f32.mrf.mxu1 }
 0x4f8   : > { %v2867_v22 = vadd.f32 %v3368_v21, %v4527_v20 }
 0x4f9   : > { %v3370_v23 = vpop.f32.mrf.mxu1 }
 0x4fa   : > { %2993 = vst [vmem:[%s4532_s19] sm:$0xff] %v2867_v22  ;;  %v3371_v24 = vadd.f32 %v3370_v23, %v3369_v42 }
 0x4fb   : > { %v3372_v25 = vpop.f32.mrf.mxu1 }
 0x4fc   : > { %v2870_v2 = vadd.f32 %v3371_v24, %v4527_v20 }
 0x4fd   : > { %v3373_v8 = vpop.f32.mrf.mxu1 }
 0x4fe   : > { %2994 = vst [vmem:[%s4532_s19 + $0x8] sm:$0xff] %v2870_v2  ;;  %v3374_v26 = vadd.f32 %v3373_v8, %v3372_v25 }
 0x4ff   : > { %v3375_v27 = vpop.f32.mrf.mxu1 }
 0x500   : > { %v2875_v28 = vadd.f32 %v3374_v26, %v4527_v20 }
 0x501   : > { %v3376_v29 = vpop.f32.mrf.mxu1 }
 0x502   : > { %2995 = vst [vmem:[%s4532_s19 + $0x10] sm:$0xff] %v2875_v28  ;;  %v3377_v30 = vadd.f32 %v3376_v29, %v3375_v27 }
 0x503   : > { %v3378_v31 = vpop.f32.mrf.mxu1 }
 0x504   : > { %v2878_v32 = vadd.f32 %v3377_v30, %v4527_v20 }
 0x505   : > { %v3379_v33 = vpop.f32.mrf.mxu1 }
 0x506   : > { %2996 = vst [vmem:[%s4532_s19 + $0x18] sm:$0xff] %v2878_v32  ;;  %v3380_v36 = vadd.f32 %v3379_v33, %v3378_v31 }
 0x507   : > { %v3381_v37 = vpop.f32.mrf.mxu1 }
 0x508   : > { %v2883_v38 = vadd.f32 %v3380_v36, %v4527_v20 }
 0x509   : > { %v3382_v39 = vpop.f32.mrf.mxu1 }
 0x50a   : > { %2997 = vst [vmem:[%s4532_s19 + $0x20] sm:$0xff] %v2883_v38  ;;  %v3383_v40 = vadd.f32 %v3382_v39, %v3381_v37 }
 0x50b   : > { %v3384_v41 = vpop.f32.mrf.mxu1 }
 0x50c   : > { %v2886_v35 = vadd.f32 %v3383_v40, %v4527_v20 }
 0x50d   : > { %v3385_v34 = vpop.f32.mrf.mxu1 }
 0x50e   : > { %2998 = vst [vmem:[%s4532_s19 + $0x28] sm:$0xff] %v2886_v35  ;;  %v3386_v46 = vadd.f32 %v3385_v34, %v3384_v41 }
 0x50f   : > { %v3387_v43 = vpop.f32.mrf.mxu1 }
 0x510   : > { %v2891_v44 = vadd.f32 %v3386_v46, %v4527_v20 }
 0x511   : > { %v3388_v45 = vpop.f32.mrf.mxu1 }
 0x512   : > { %2999 = vst [vmem:[%s4532_s19 + $0x30] sm:$0xff] %v2891_v44  ;;  %v3389_v47 = vadd.f32 %v3388_v45, %v3387_v43 }
 0x513   : > { %v3390_v49 = vpop.f32.mrf.mxu1 }
 0x514   : > { %v2894_v50 = vadd.f32 %v3389_v47, %v4527_v20 }
 0x515   : > { %v3391_v51 = vpop.f32.mrf.mxu1 }
 0x516   : > { %3000 = vst [vmem:[%s4532_s19 + $0x38] sm:$0xff] %v2894_v50  ;;  %v3392_v52 = vadd.f32 %v3391_v51, %v3390_v49 }
 0x517   : > { %v3393_v53 = vpop.f32.mrf.mxu1 }
 0x518   : > { %v2899_v54 = vadd.f32 %v3392_v52, %v4527_v20 }
 0x519   : > { %v3394_v55 = vpop.f32.mrf.mxu1 }
 0x51a   : > { %3001 = vst [vmem:[%s4532_s19 + $0x40] sm:$0xff] %v2899_v54  ;;  %v3395_v57 = vadd.f32 %v3394_v55, %v3393_v53 }
 0x51b   : > { %v3396_v58 = vpop.f32.mrf.mxu1 }
 0x51c   : > { %v2902_v56 = vadd.f32 %v3395_v57, %v4527_v20 }
 0x51d   : > { %v3397_v62 = vpop.f32.mrf.mxu1 }
 0x51e   : > { %3002 = vst [vmem:[%s4532_s19 + $0x48] sm:$0xff] %v2902_v56  ;;  %v3398_v59 = vadd.f32 %v3397_v62, %v3396_v58 }
 0x51f   : > { %v3399_v60 = vpop.f32.mrf.mxu1 }
 0x520   : > { %v2907_v61 = vadd.f32 %v3398_v59, %v4527_v20 }
 0x521   : > { %v3400_v63 = vpop.f32.mrf.mxu1 }
 0x522   : > { %3003 = vst [vmem:[%s4532_s19 + $0x50] sm:$0xff] %v2907_v61  ;;  %v3401_v0 = vadd.f32 %v3400_v63, %v3399_v60 }
 0x523   : > { %v3402_v1 = vpop.f32.mrf.mxu1 }
 0x524   : > { %v2910_v3 = vadd.f32 %v3401_v0, %v4527_v20 }
 0x525   : > { %v3403_v4 = vpop.f32.mrf.mxu1 }
 0x526   : > { %3004 = vst [vmem:[%s4532_s19 + $0x58] sm:$0xff] %v2910_v3  ;;  %v3404_v5 = vadd.f32 %v3403_v4, %v3402_v1 }
 0x527   : > { %v3405_v6 = vpop.f32.mrf.mxu1 }
 0x528   : > { %v2915_v7 = vadd.f32 %v3404_v5, %v4527_v20 }
 0x529   : > { %v3406_v9 = vpop.f32.mrf.mxu1 }
 0x52a   : > { %3005 = vst [vmem:[%s4532_s19 + $0x60] sm:$0xff] %v2915_v7  ;;  %v3407_v10 = vadd.f32 %v3406_v9, %v3405_v6 }
 0x52b   : > { %v3408_v11 = vpop.f32.mrf.mxu1 }
 0x52c   : > { %v2918_v12 = vadd.f32 %v3407_v10, %v4527_v20 }
 0x52d   : > { %v3409_v13 = vpop.f32.mrf.mxu1 }
 0x52e   : > { %3006 = vst [vmem:[%s4532_s19 + $0x68] sm:$0xff] %v2918_v12  ;;  %v3410_v14 = vadd.f32 %v3409_v13, %v3408_v11 }
 0x52f   : > { %v3411_v15 = vpop.f32.mrf.mxu1 }
 0x530   : > { %v2923_v16 = vadd.f32 %v3410_v14, %v4527_v20 }
 0x531   : > { %v3412_v17 = vpop.f32.mrf.mxu1 }
 0x532   : > { %3007 = vst [vmem:[%s4532_s19 + $0x70] sm:$0xff] %v2923_v16  ;;  %v3413_v18 = vadd.f32 %v3412_v17, %v3411_v15 }
 0x533   : > { %v3414_v19 = vpop.f32.mrf.mxu1 }
 0x534   : > { %v2926_v48 = vadd.f32 %v3413_v18, %v4527_v20 }
 0x535   : > { %v3415_v21 = vpop.f32.mrf.mxu1 }
 0x536   : > { %3008 = vst [vmem:[%s4532_s19 + $0x78] sm:$0xff] %v2926_v48  ;;  %v3416_v42 = vadd.f32 %v3415_v21, %v3414_v19 }
 0x537   : > { %v3417_v22 = vpop.f32.mrf.mxu1 }
 0x538   : > { %v2931_v23 = vadd.f32 %v3416_v42, %v4527_v20 }
 0x539   : > { %v3418_v24 = vpop.f32.mrf.mxu1 }
 0x53a   : > { %3009 = vst [vmem:[%s4532_s19 + $0x80] sm:$0xff] %v2931_v23  ;;  %v3419_v25 = vadd.f32 %v3418_v24, %v3417_v22 }
 0x53b   : > { %v3420_v2 = vpop.f32.mrf.mxu1 }
 0x53c   : > { %v2934_v8 = vadd.f32 %v3419_v25, %v4527_v20 }
 0x53d   : > { %v3421_v26 = vpop.f32.mrf.mxu1 }
 0x53e   : > { %3010 = vst [vmem:[%s4532_s19 + $0x88] sm:$0xff] %v2934_v8  ;;  %v3422_v27 = vadd.f32 %v3421_v26, %v3420_v2 }
 0x53f   : > { %v3423_v28 = vpop.f32.mrf.mxu1 }
 0x540   : > { %v2939_v29 = vadd.f32 %v3422_v27, %v4527_v20 }
 0x541   : > { %v3424_v30 = vpop.f32.mrf.mxu1 }
 0x542   : > { %3011 = vst [vmem:[%s4532_s19 + $0x90] sm:$0xff] %v2939_v29  ;;  %v3425_v31 = vadd.f32 %v3424_v30, %v3423_v28 }
 0x543   : > { %v3426_v32 = vpop.f32.mrf.mxu1 }
 0x544   : > { %v2942_v33 = vadd.f32 %v3425_v31, %v4527_v20 }
 0x545   : > { %v3427_v36 = vpop.f32.mrf.mxu1 }
 0x546   : > { %3012 = vst [vmem:[%s4532_s19 + $0x98] sm:$0xff] %v2942_v33  ;;  %v3428_v37 = vadd.f32 %v3427_v36, %v3426_v32 }
 0x547   : > { %v3429_v38 = vpop.f32.mrf.mxu1 }
 0x548   : > { %v2947_v39 = vadd.f32 %v3428_v37, %v4527_v20 }
 0x549   : > { %v3430_v40 = vpop.f32.mrf.mxu1 }
 0x54a   : > { %3013 = vst [vmem:[%s4532_s19 + $0xa0] sm:$0xff] %v2947_v39  ;;  %v3431_v41 = vadd.f32 %v3430_v40, %v3429_v38 }
 0x54b   : > { %v3432_v35 = vpop.f32.mrf.mxu1 }
 0x54c   : > { %v2950_v34 = vadd.f32 %v3431_v41, %v4527_v20 }
 0x54d   : > { %v3433_v46 = vpop.f32.mrf.mxu1 }
 0x54e   : > { %3014 = vst [vmem:[%s4532_s19 + $0xa8] sm:$0xff] %v2950_v34  ;;  %v3434_v43 = vadd.f32 %v3433_v46, %v3432_v35 }
 0x54f   : > { %v3435_v44 = vpop.f32.mrf.mxu1 }
 0x550   : > { %v2955_v45 = vadd.f32 %v3434_v43, %v4527_v20 }
 0x551   : > { %v3436_v47 = vpop.f32.mrf.mxu1 }
 0x552   : > { %3015 = vst [vmem:[%s4532_s19 + $0xb0] sm:$0xff] %v2955_v45  ;;  %v3437_v49 = vadd.f32 %v3436_v47, %v3435_v44 }
 0x553   : > { %v3438_v50 = vpop.f32.mrf.mxu1 }
 0x554   : > { %v2958_v51 = vadd.f32 %v3437_v49, %v4527_v20 }
 0x555   : > { %v3439_v52 = vpop.f32.mrf.mxu1 }
 0x556   : > { %3016 = vst [vmem:[%s4532_s19 + $0xb8] sm:$0xff] %v2958_v51  ;;  %v3440_v53 = vadd.f32 %v3439_v52, %v3438_v50 }
 0x557   : > { %v3441_v54 = vpop.f32.mrf.mxu1 }
 0x558   : > { %v2963_v55 = vadd.f32 %v3440_v53, %v4527_v20 }
 0x559   : > { %v3442_v57 = vpop.f32.mrf.mxu1 }
 0x55a   : > { %3017 = vst [vmem:[%s4532_s19 + $0xc0] sm:$0xff] %v2963_v55  ;;  %v3443_v58 = vadd.f32 %v3442_v57, %v3441_v54 }
 0x55b   : > { %v3444_v56 = vpop.f32.mrf.mxu1 }
 0x55c   : > { %v2966_v62 = vadd.f32 %v3443_v58, %v4527_v20 }
 0x55d   : > { %v3445_v59 = vpop.f32.mrf.mxu1 }
 0x55e   : > { %3018 = vst [vmem:[%s4532_s19 + $0xc8] sm:$0xff] %v2966_v62  ;;  %v3446_v60 = vadd.f32 %v3445_v59, %v3444_v56 }
 0x55f   : > { %v3447_v61 = vpop.f32.mrf.mxu1 }
 0x560   : > { %v2971_v63 = vadd.f32 %v3446_v60, %v4527_v20 }
 0x561   : > { %v3448_v0 = vpop.f32.mrf.mxu1 }
 0x562   : > { %3019 = vst [vmem:[%s4532_s19 + $0xd0] sm:$0xff] %v2971_v63  ;;  %v3449_v1 = vadd.f32 %v3448_v0, %v3447_v61 }
 0x563   : > { %v3450_v3 = vpop.f32.mrf.mxu1 }
 0x564   : > { %v2974_v4 = vadd.f32 %v3449_v1, %v4527_v20 }
 0x565   : > { %v3451_v5 = vpop.f32.mrf.mxu1 }
 0x566   : > { %3020 = vst [vmem:[%s4532_s19 + $0xd8] sm:$0xff] %v2974_v4  ;;  %v3452_v6 = vadd.f32 %v3451_v5, %v3450_v3 }
 0x567   : > { %v3453_v7 = vpop.f32.mrf.mxu1 }
 0x568   : > { %v2979_v9 = vadd.f32 %v3452_v6, %v4527_v20 }
 0x569   : > { %v3454_v10 = vpop.f32.mrf.mxu1 }
 0x56a   : > { %3021 = vst [vmem:[%s4532_s19 + $0xe0] sm:$0xff] %v2979_v9  ;;  %v3455_v11 = vadd.f32 %v3454_v10, %v3453_v7 }
 0x56b   : > { %v3456_v12 = vpop.f32.mrf.mxu1 }
 0x56c   : > { %v2982_v13 = vadd.f32 %v3455_v11, %v4527_v20 }
 0x56d   : > { %v3457_v14 = vpop.f32.mrf.mxu1 }
 0x56e   : > { %3022 = vst [vmem:[%s4532_s19 + $0xe8] sm:$0xff] %v2982_v13  ;;  %v3458_v15 = vadd.f32 %v3457_v14, %v3456_v12 }
 0x56f   : > { %v3459_v16 = vpop.f32.mrf.mxu1 }
 0x570   : > { %v2987_v17 = vadd.f32 %v3458_v15, %v4527_v20 }
 0x571   : > { %v3460_v18 = vpop.f32.mrf.mxu1 }
 0x572   : > { %3023 = vst [vmem:[%s4532_s19 + $0xf0] sm:$0xff] %v2987_v17  ;;  %v3461_v19 = vadd.f32 %v3460_v18, %v3459_v16 }
 0x574   : > { %v2990_v48 = vadd.f32 %v3461_v19, %v4527_v20 }
 0x576   : > { %3024 = vst [vmem:[%s4532_s19 + $0xf8] sm:$0xff] %v2990_v48 }
 0x577 PF: > { %s23_s25 = sadd.s32 1, %s3669_s25  }
 0x578   : > { %p20_p4 = scmp.ge.s32.totalorder %s23_s25, 4  }
 0x57a   :  { %22 = sbr.rel (!%p20_p4) target bundleno = 1 (0x1), region = 102 }

</bundles_post_ra>
